<compile_context>
chip_gen: v6e
topology: v6e:2x2x1
jax: 0.10.0
libtpu: 0.0.40
codegen_flags: <defaults>
</compile_context>

<pallas_src>
import functools
import math

import jax
import jax.numpy as jnp
from jax.experimental import pallas as pl
from jax.experimental.pallas import tpu as pltpu


# ----------------------------------------------------------------------------
# helpers
# ----------------------------------------------------------------------------
def _pick_tile(dim, target):
    """Largest clean tile: `target` if it evenly divides `dim`, else full dim.

    `target` values below are multiples of 8/128 so the (8, 128) block rule is
    always satisfied (either divisible, or equal to the full array dim).
    """
    if dim <= target:
        return dim
    return target if dim % target == 0 else dim


# ----------------------------------------------------------------------------
# LayerNorm kernel
# ----------------------------------------------------------------------------
def _layernorm_kernel(x_ref, g_ref, b_ref, o_ref, *, eps):
    x = x_ref[...].astype(jnp.float32)
    mu = jnp.mean(x, axis=-1, keepdims=True)
    xc = x - mu
    var = jnp.mean(xc * xc, axis=-1, keepdims=True)
    inv = jax.lax.rsqrt(var + eps)
    y = xc * (inv * g_ref[...].astype(jnp.float32)) + b_ref[...].astype(jnp.float32)
    o_ref[...] = y.astype(o_ref.dtype)


def layernorm(x2d, gamma, beta, eps=1e-5):
    """x2d: (R, D) -> (R, D). Row-tiled, gamma/beta stay resident in VMEM."""
    R, D = x2d.shape
    TR = _pick_tile(R, 256)
    grid = (R // TR,)
    return pl.pallas_call(
        functools.partial(_layernorm_kernel, eps=eps),
        out_shape=jax.ShapeDtypeStruct((R, D), x2d.dtype),
        grid_spec=pltpu.PrefetchScalarGridSpec(
            num_scalar_prefetch=0,
            grid=grid,
            in_specs=[
                pl.BlockSpec((TR, D), lambda i: (i, 0)),
                pl.BlockSpec((1, D), lambda i: (0, 0)),
                pl.BlockSpec((1, D), lambda i: (0, 0)),
            ],
            out_specs=pl.BlockSpec((TR, D), lambda i: (i, 0)),
        ),
        compiler_params=pltpu.CompilerParams(dimension_semantics=("parallel",)),
    )(x2d, gamma.reshape(1, D), beta.reshape(1, D))


# ----------------------------------------------------------------------------
# Linear (matmul + bias [+ ReLU] [+ residual]) kernel
# ----------------------------------------------------------------------------
def _linear_kernel(x_ref, w_ref, b_ref, *rest, activation, has_residual):
    if has_residual:
        r_ref, o_ref, acc_ref = rest
    else:
        o_ref, acc_ref = rest

    @pl.when(pl.program_id(2) == 0)
    def _():
        acc_ref[...] = jnp.zeros_like(acc_ref)

    acc_ref[...] += jnp.dot(
        x_ref[...].astype(jnp.float32),
        w_ref[...].astype(jnp.float32),
        preferred_element_type=jnp.float32,
    )

    @pl.when(pl.program_id(2) == pl.num_programs(2) - 1)
    def _():
        y = acc_ref[...] + b_ref[...].astype(jnp.float32)
        if activation == "relu":
            y = jnp.maximum(y, 0.0)
        if has_residual:
            y = y + r_ref[...].astype(jnp.float32)
        o_ref[...] = y.astype(o_ref.dtype)


def linear(x, w, b, residual=None, activation=None):
    """y = x @ w + b (+ relu) (+ residual).  x:(M,K)  w:(K,N)  b:(N,)."""
    M, K = x.shape
    K2, N = w.shape
    assert K == K2
    TM = _pick_tile(M, 256)
    TN = _pick_tile(N, 256)
    TK = _pick_tile(K, 512)
    grid = (M // TM, N // TN, K // TK)

    in_specs = [
        pl.BlockSpec((TM, TK), lambda i, j, k: (i, k)),
        pl.BlockSpec((TK, TN), lambda i, j, k: (k, j)),
        pl.BlockSpec((1, TN), lambda i, j, k: (0, j)),
    ]
    args = [x, w, b.reshape(1, N)]
    if residual is not None:
        in_specs.append(pl.BlockSpec((TM, TN), lambda i, j, k: (i, j)))
        args.append(residual)

    kernel = functools.partial(
        _linear_kernel, activation=activation, has_residual=residual is not None
    )
    return pl.pallas_call(
        kernel,
        out_shape=jax.ShapeDtypeStruct((M, N), x.dtype),
        grid_spec=pltpu.PrefetchScalarGridSpec(
            num_scalar_prefetch=0,
            grid=grid,
            in_specs=in_specs,
            out_specs=pl.BlockSpec((TM, TN), lambda i, j, k: (i, j)),
            scratch_shapes=[pltpu.VMEM((TM, TN), jnp.float32)],
        ),
        compiler_params=pltpu.CompilerParams(
            dimension_semantics=("parallel", "parallel", "arbitrary")
        ),
    )(*args)


# ----------------------------------------------------------------------------
# Attention kernel (one batch element per grid step, all heads unrolled)
# ----------------------------------------------------------------------------
def _attention_kernel(qkv_ref, bias_ref, o_ref, *, H, dk, scale):
    dh = H * dk
    qkv = qkv_ref[...].astype(jnp.float32)       # (S, 3*dh)
    bias = bias_ref[...].astype(jnp.float32)     # (1, S) additive mask bias

    outs = []
    for h in range(H):                           # static unroll (H is small)
        q = qkv[:, h * dk:(h + 1) * dk] * scale            # fold scale into Q
        k = qkv[:, dh + h * dk: dh + (h + 1) * dk]
        v = qkv[:, 2 * dh + h * dk: 2 * dh + (h + 1) * dk]

        # scores = (Q K^T) / sqrt(dk) + mask_bias          -- MXU
        s = jax.lax.dot_general(
            q, k, (((1,), (1,)), ((), ())), preferred_element_type=jnp.float32
        ) + bias                                            # (S, S)

        # numerically stable softmax over keys
        m = jnp.max(s, axis=-1, keepdims=True)
        e = jnp.exp(s - m)
        p = e * pl.reciprocal(jnp.sum(e, axis=-1, keepdims=True))

        # out_h = P V                                       -- MXU
        outs.append(jnp.dot(p, v, preferred_element_type=jnp.float32))

    # one full-width lane-dense store instead of H narrow column stores
    o_ref[...] = jnp.concatenate(outs, axis=-1).astype(o_ref.dtype)


def mha_attention(qkv, bias_b, H, dk, scale):
    """qkv: (B, S, 3*d_hidden), bias_b: (B, 1, S) additive (0 / -1e30).

    Returns (B, S, d_hidden) with heads already re-interleaved along features.
    """
    B, S, three_dh = qkv.shape
    dh = three_dh // 3
    # TODO(synk): for long sequences, tile the KV axis flash-style (online
    # softmax) instead of holding the full (S, S) score block per head.
    return pl.pallas_call(
        functools.partial(_attention_kernel, H=H, dk=dk, scale=scale),
        out_shape=jax.ShapeDtypeStruct((B, S, dh), qkv.dtype),
        grid_spec=pltpu.PrefetchScalarGridSpec(
            num_scalar_prefetch=0,
            grid=(B,),
            in_specs=[
                pl.BlockSpec((None, S, three_dh), lambda i: (i, 0, 0)),
                pl.BlockSpec((None, 1, S), lambda i: (i, 0, 0)),
            ],
            out_specs=pl.BlockSpec((None, S, dh), lambda i: (i, 0, 0)),
        ),
        compiler_params=pltpu.CompilerParams(dimension_semantics=("parallel",)),
    )(qkv, bias_b)


# ----------------------------------------------------------------------------
# Encoder forward (wrapper plumbing around the kernels)
# ----------------------------------------------------------------------------
def encoder_layer_forward(x, p, bias_b, H):
    B, S, D = x.shape
    d_hidden = p["Wq"].shape[1]
    dk = d_hidden // H
    scale = 1.0 / math.sqrt(dk)

    x2 = x.reshape(B * S, D)

    # --- sublayer 0: x + out_proj(attention(LN(x))) ---
    xn = layernorm(x2, p["ln0_g"], p["ln0_b"])
    # fused QKV projection: one matmul, activations read once
    qkv = linear(xn, p["Wqkv"], p["bqkv"]).reshape(B, S, 3 * d_hidden)
    att = mha_attention(qkv, bias_b, H, dk, scale).reshape(B * S, d_hidden)
    y2 = linear(att, p["Wo"], p["bo"], residual=x2)            # fused residual add

    # --- sublayer 1: y + fc2(relu(fc1(LN(y)))) ---
    yn = layernorm(y2, p["ln1_g"], p["ln1_b"])
    h = linear(yn, p["W1"], p["b1"], activation="relu")        # fused ReLU
    z2 = linear(h, p["W2"], p["b2"], residual=y2)              # fused residual add
    return z2.reshape(B, S, D)


def _fuse_qkv(p):
    q = dict(p)
    q["Wqkv"] = jnp.concatenate([p["Wq"], p["Wk"], p["Wv"]], axis=1)
    q["bqkv"] = jnp.concatenate([p["bq"], p["bk"], p["bv"]], axis=0)
    return q


def encoder_forward(x, layer_params_list, src_mask, H):
    """x: (B, S, d_model), src_mask: (B, 1, S) with 1 = keep, 0 = mask."""
    B, S, D = x.shape
    if src_mask is None:
        bias_b = jnp.zeros((B, 1, S), jnp.float32)
    else:
        bias_b = jnp.where(src_mask > 0, 0.0, -1e30).astype(jnp.float32)

    for p in layer_params_list:
        x = encoder_layer_forward(x, _fuse_qkv(p), bias_b, H)
    return x
    # NOTE: dropout layers are identity in eval/inference mode (not implemented).


# ----------------------------------------------------------------------------
# pure-JAX reference (same math, no Pallas) for the self-check
# ----------------------------------------------------------------------------
def _ref_layernorm(x, g, b, eps=1e-5):
    mu = x.mean(-1, keepdims=True)
    var = ((x - mu) ** 2).mean(-1, keepdims=True)
    return (x - mu) / jnp.sqrt(var + eps) * g + b


def _ref_encoder_layer(x, p, bias, H):
    B, S, D = x.shape
    d_hidden = p["Wq"].shape[1]
    dk = d_hidden // H
    scale = 1.0 / math.sqrt(dk)

    xn = _ref_layernorm(x, p["ln0_g"], p["ln0_b"])
    q = xn @ p["Wq"] + p["bq"]
    k = xn @ p["Wk"] + p["bk"]
    v = xn @ p["Wv"] + p["bv"]

    def to_heads(t):
        return t.reshape(B, S, H, dk).transpose(0, 2, 1, 3)

    s = jnp.einsum("bhqd,bhkd->bhqk", to_heads(q), to_heads(k)) * scale
    s = s + bias[:, :, None, :]                       # (B,1,1,S) broadcast
    att = jnp.einsum("bhqk,bhkd->bhqd", jax.nn.softmax(s, axis=-1), to_heads(v))
    att = att.transpose(0, 2, 1, 3).reshape(B, S, d_hidden)
    y = x + (att @ p["Wo"] + p["bo"])

    yn = _ref_layernorm(y, p["ln1_g"], p["ln1_b"])
    h = jnp.maximum(yn @ p["W1"] + p["b1"], 0.0)
    return y + (h @ p["W2"] + p["b2"])


def ref_encoder(x, layer_params_list, src_mask, H):
    B, S, D = x.shape
    if src_mask is None:
        bias = jnp.zeros((B, 1, S), jnp.float32)
    else:
        bias = jnp.where(src_mask > 0, 0.0, -1e30).astype(jnp.float32)
    for p in layer_params_list:
        x = _ref_encoder_layer(x, p, bias, H)
    return x


# ----------------------------------------------------------------------------
# deterministic parameter init (xavier-uniform for matrices, like the module)
# ----------------------------------------------------------------------------
def init_layer_params(key, d_model, d_hidden, d_ff):
    ks = jax.random.split(key, 12)

    def xavier(k, fan_in, fan_out):
        lim = math.sqrt(6.0 / (fan_in + fan_out))
        return jax.random.uniform(k, (fan_in, fan_out), jnp.float32, -lim, lim)

    def bias_init(k, fan_in, n):
        lim = 1.0 / math.sqrt(fan_in)
        return jax.random.uniform(k, (n,), jnp.float32, -lim, lim)

    return {
        "Wq": xavier(ks[0], d_model, d_hidden), "bq": bias_init(ks[1], d_model, d_hidden),
        "Wk": xavier(ks[2], d_model, d_hidden), "bk": bias_init(ks[3], d_model, d_hidden),
        "Wv": xavier(ks[4], d_model, d_hidden), "bv": bias_init(ks[5], d_model, d_hidden),
        "Wo": xavier(ks[6], d_hidden, d_model), "bo": bias_init(ks[7], d_hidden, d_model),
        "W1": xavier(ks[8], d_model, d_ff),     "b1": bias_init(ks[9], d_model, d_ff),
        "W2": xavier(ks[10], d_ff, d_model),    "b2": bias_init(ks[11], d_ff, d_model),
        "ln0_g": jnp.ones((d_model,), jnp.float32), "ln0_b": jnp.zeros((d_model,), jnp.float32),
        "ln1_g": jnp.ones((d_model,), jnp.float32), "ln1_b": jnp.zeros((d_model,), jnp.float32),
    }


if __name__ == "__main__":
    # small deterministic shapes: B=2, S=8, d_model=32, H=4 (dk=8), d_ff=128, N=2
    B, S, d_model, H, d_ff, N_layers = 2, 8, 32, 4, 128, 2
    d_hidden = d_model

    key = jax.random.PRNGKey(0)
    kx, kp = jax.random.split(key)
    x = jax.random.normal(kx, (B, S, d_model), dtype=jnp.float32)

    # Encoder clones one initialized EncoderLayer N times -> shared init.
    layer_params = init_layer_params(kp, d_model, d_hidden, d_ff)
    params = [layer_params] * N_layers

    # src_mask (B, 1, S): mask out the last two key positions of batch 1
    src_mask = jnp.ones((B, 1, S), jnp.int32).at[1, 0, S - 2:].set(0)

    fwd = jax.jit(functools.partial(encoder_forward, H=H))
    out = fwd(x, params, src_mask)
    out = jax.block_until_ready(out)

    ref = ref_encoder(x, params, src_mask, H)
    assert out.shape == (B, S, d_model)
    assert jnp.allclose(out, ref, atol=2e-4, rtol=2e-4), (out, ref)

    print("KERNEL_OK")
</pallas_src>

<mosaic_0001>
module attributes {stable_mosaic.version = 11 : i64} {
  func.func @_layernorm_kernel(%arg0: i32, %arg1: memref<16x32xf32, #tpu.memory_space<vmem>>, %arg2: memref<1x32xf32, #tpu.memory_space<vmem>>, %arg3: memref<1x32xf32, #tpu.memory_space<vmem>>, %arg4: memref<16x32xf32, #tpu.memory_space<vmem>>) attributes {dimension_semantics = [#tpu.dimension_semantics<parallel>], iteration_bounds = array<i64: 1>, scalar_prefetch = 0 : i64, scratch_operands = 0 : i64, tpu.core_type = #tpu.core_type<tc>, window_params = [{transform_indices = @transform_0, window_bounds = array<i64: 16, 32>}, {pipeline_mode = #tpu.pipeline_mode<synchronous>, transform_indices = @transform_1, window_bounds = array<i64: 1, 32>}, {pipeline_mode = #tpu.pipeline_mode<synchronous>, transform_indices = @transform_2, window_bounds = array<i64: 1, 32>}, {transform_indices = @transform_3, window_bounds = array<i64: 16, 32>}]} {
    %c0 = arith.constant 0 : index
    %c0_0 = arith.constant 0 : index
    %0 = vector.load %arg1[%c0, %c0_0] : memref<16x32xf32, #tpu.memory_space<vmem>>, vector<16x32xf32>
    %cst = arith.constant dense<0.000000e+00> : vector<16xf32>
    %1 = vector.multi_reduction <add>, %0, %cst [1] : vector<16x32xf32> to vector<16xf32>
    %2 = vector.shape_cast %1 : vector<16xf32> to vector<16x1xf32>
    %cst_1 = arith.constant 3.200000e+01 : f32
    %3 = vector.broadcast %cst_1 : f32 to vector<16x1xf32>
    %4 = arith.divf %2, %3 : vector<16x1xf32>
    %5 = vector.broadcast %4 : vector<16x1xf32> to vector<16x32xf32>
    %6 = arith.subf %0, %5 : vector<16x32xf32>
    %7 = arith.mulf %6, %6 : vector<16x32xf32>
    %cst_2 = arith.constant dense<0.000000e+00> : vector<16xf32>
    %8 = vector.multi_reduction <add>, %7, %cst_2 [1] : vector<16x32xf32> to vector<16xf32>
    %9 = vector.shape_cast %8 : vector<16xf32> to vector<16x1xf32>
    %cst_3 = arith.constant 3.200000e+01 : f32
    %10 = vector.broadcast %cst_3 : f32 to vector<16x1xf32>
    %11 = arith.divf %9, %10 : vector<16x1xf32>
    %cst_4 = arith.constant 9.99999974E-6 : f32
    %12 = vector.broadcast %cst_4 : f32 to vector<16x1xf32>
    %13 = arith.addf %11, %12 : vector<16x1xf32>
    %14 = math.rsqrt %13 : vector<16x1xf32>
    %c0_5 = arith.constant 0 : index
    %c0_6 = arith.constant 0 : index
    %15 = vector.load %arg2[%c0_5, %c0_6] : memref<1x32xf32, #tpu.memory_space<vmem>>, vector<1x32xf32>
    %16 = vector.broadcast %14 : vector<16x1xf32> to vector<16x32xf32>
    %17 = vector.broadcast %15 : vector<1x32xf32> to vector<16x32xf32>
    %18 = arith.mulf %16, %17 : vector<16x32xf32>
    %19 = arith.mulf %6, %18 : vector<16x32xf32>
    %c0_7 = arith.constant 0 : index
    %c0_8 = arith.constant 0 : index
    %20 = vector.load %arg3[%c0_7, %c0_8] : memref<1x32xf32, #tpu.memory_space<vmem>>, vector<1x32xf32>
    %21 = vector.broadcast %20 : vector<1x32xf32> to vector<16x32xf32>
    %22 = arith.addf %19, %21 : vector<16x32xf32>
    %c0_9 = arith.constant 0 : index
    %c0_10 = arith.constant 0 : index
    %23 = vector.load %arg4[%c0_9, %c0_10] : memref<16x32xf32, #tpu.memory_space<vmem>>, vector<16x32xf32>
    tpu.vector_store %arg4[%c0_9, %c0_10], %22 {strides = array<i32>} : memref<16x32xf32, #tpu.memory_space<vmem>>, vector<16x32xf32>,
    return
  }
  func.func @transform_0(%arg0: i32) -> (i32, i32) {
    %c0_i32 = arith.constant 0 : i32
    %c0_i32_0 = arith.constant 0 : i32
    return %arg0, %c0_i32 : i32, i32
  }
  func.func @transform_1(%arg0: i32) -> (i32, i32) {
    %c0_i32 = arith.constant 0 : i32
    %c0_i32_0 = arith.constant 0 : i32
    %c0_i32_1 = arith.constant 0 : i32
    return %c0_i32, %c0_i32_0 : i32, i32
  }
  func.func @transform_2(%arg0: i32) -> (i32, i32) {
    %c0_i32 = arith.constant 0 : i32
    %c0_i32_0 = arith.constant 0 : i32
    %c0_i32_1 = arith.constant 0 : i32
    return %c0_i32, %c0_i32_0 : i32, i32
  }
  func.func @transform_3(%arg0: i32) -> (i32, i32) {
    %c0_i32 = arith.constant 0 : i32
    %c0_i32_0 = arith.constant 0 : i32
    return %arg0, %c0_i32 : i32, i32
  }
}

module attributes {stable_mosaic.version = 11 : i64} {
  func.func @_linear_kernel(%arg0: i32, %arg1: i32, %arg2: i32, %arg3: memref<16x32xf32, #tpu.memory_space<vmem>>, %arg4: memref<32x96xf32, #tpu.memory_space<vmem>>, %arg5: memref<1x96xf32, #tpu.memory_space<vmem>>, %arg6: memref<16x96xf32, #tpu.memory_space<vmem>>, %arg7: memref<16x96xf32, #tpu.memory_space<vmem>>) attributes {dimension_semantics = [#tpu.dimension_semantics<parallel>, #tpu.dimension_semantics<parallel>, #tpu.dimension_semantics<arbitrary>], iteration_bounds = array<i64: 1, 1, 1>, scalar_prefetch = 0 : i64, scratch_operands = 1 : i64, tpu.core_type = #tpu.core_type<tc>, window_params = [{transform_indices = @transform_0, window_bounds = array<i64: 16, 32>}, {transform_indices = @transform_1, window_bounds = array<i64: 32, 96>}, {transform_indices = @transform_2, window_bounds = array<i64: 1, 96>}, {transform_indices = @transform_3, window_bounds = array<i64: 16, 96>}]} {
    %c0_i32 = arith.constant 0 : i32
    %0 = arith.cmpi eq, %arg2, %c0_i32 : i32
    %1 = arith.extui %0 : i1 to i32
    %c0_i32_0 = arith.constant 0 : i32
    %2 = arith.cmpi ne, %1, %c0_i32_0 : i32
    scf.if %2 {
      %cst_10 = arith.constant 0.000000e+00 : f32
      %12 = vector.broadcast %cst_10 : f32 to vector<16x96xf32>
      %c0_11 = arith.constant 0 : index
      %c0_12 = arith.constant 0 : index
      %13 = vector.load %arg7[%c0_11, %c0_12] : memref<16x96xf32, #tpu.memory_space<vmem>>, vector<16x96xf32>
      tpu.vector_store %arg7[%c0_11, %c0_12], %12 {strides = array<i32>} : memref<16x96xf32, #tpu.memory_space<vmem>>, vector<16x96xf32>,
    } else {
    }
    %c0 = arith.constant 0 : index
    %c0_1 = arith.constant 0 : index
    %3 = vector.load %arg7[%c0, %c0_1] : memref<16x96xf32, #tpu.memory_space<vmem>>, vector<16x96xf32>
    %c0_2 = arith.constant 0 : index
    %c0_3 = arith.constant 0 : index
    %4 = vector.load %arg3[%c0_2, %c0_3] : memref<16x32xf32, #tpu.memory_space<vmem>>, vector<16x32xf32>
    %c0_4 = arith.constant 0 : index
    %c0_5 = arith.constant 0 : index
    %5 = vector.load %arg4[%c0_4, %c0_5] : memref<32x96xf32, #tpu.memory_space<vmem>>, vector<32x96xf32>
    %cst = arith.constant dense<0.000000e+00> : vector<16x96xf32>
    %6 = tpu.matmul %4, %5, %cst {dimension_numbers = #tpu.dot_dimension_numbers<[1], [0], [0], [1], [0, 0, 1, 1], [], []>} : vector<16x32xf32>, vector<32x96xf32>, vector<16x96xf32> -> vector<16x96xf32>
    %7 = arith.addf %3, %6 : vector<16x96xf32>
    %c0_6 = arith.constant 0 : index
    %c0_7 = arith.constant 0 : index
    %8 = vector.load %arg7[%c0_6, %c0_7] : memref<16x96xf32, #tpu.memory_space<vmem>>, vector<16x96xf32>
    tpu.vector_store %arg7[%c0_6, %c0_7], %7 {strides = array<i32>} : memref<16x96xf32, #tpu.memory_space<vmem>>, vector<16x96xf32>,
    %c0_i32_8 = arith.constant 0 : i32
    %9 = arith.cmpi eq, %arg2, %c0_i32_8 : i32
    %10 = arith.extui %9 : i1 to i32
    %c0_i32_9 = arith.constant 0 : i32
    %11 = arith.cmpi ne, %10, %c0_i32_9 : i32
    scf.if %11 {
      %c0_10 = arith.constant 0 : index
      %c0_11 = arith.constant 0 : index
      %12 = vector.load %arg7[%c0_10, %c0_11] : memref<16x96xf32, #tpu.memory_space<vmem>>, vector<16x96xf32>
      %c0_12 = arith.constant 0 : index
      %c0_13 = arith.constant 0 : index
      %13 = vector.load %arg5[%c0_12, %c0_13] : memref<1x96xf32, #tpu.memory_space<vmem>>, vector<1x96xf32>
      %14 = vector.broadcast %13 : vector<1x96xf32> to vector<16x96xf32>
      %15 = arith.addf %12, %14 : vector<16x96xf32>
      %c0_14 = arith.constant 0 : index
      %c0_15 = arith.constant 0 : index
      %16 = vector.load %arg6[%c0_14, %c0_15] : memref<16x96xf32, #tpu.memory_space<vmem>>, vector<16x96xf32>
      tpu.vector_store %arg6[%c0_14, %c0_15], %15 {strides = array<i32>} : memref<16x96xf32, #tpu.memory_space<vmem>>, vector<16x96xf32>,
    } else {
    }
    return
  }
  func.func @transform_0(%arg0: i32, %arg1: i32, %arg2: i32) -> (i32, i32) {
    %c0_i32 = arith.constant 0 : i32
    return %arg0, %arg2 : i32, i32
  }
  func.func @transform_1(%arg0: i32, %arg1: i32, %arg2: i32) -> (i32, i32) {
    %c0_i32 = arith.constant 0 : i32
    return %arg2, %arg1 : i32, i32
  }
  func.func @transform_2(%arg0: i32, %arg1: i32, %arg2: i32) -> (i32, i32) {
    %c0_i32 = arith.constant 0 : i32
    %c0_i32_0 = arith.constant 0 : i32
    return %c0_i32, %arg1 : i32, i32
  }
  func.func @transform_3(%arg0: i32, %arg1: i32, %arg2: i32) -> (i32, i32) {
    %c0_i32 = arith.constant 0 : i32
    return %arg0, %arg1 : i32, i32
  }
}

module attributes {stable_mosaic.version = 11 : i64} {
  func.func @_attention_kernel(%arg0: i32, %arg1: memref<1x8x96xf32, #tpu.memory_space<vmem>>, %arg2: memref<1x1x8xf32, #tpu.memory_space<vmem>>, %arg3: memref<1x8x32xf32, #tpu.memory_space<vmem>>) attributes {dimension_semantics = [#tpu.dimension_semantics<parallel>], iteration_bounds = array<i64: 2>, scalar_prefetch = 0 : i64, scratch_operands = 0 : i64, tpu.core_type = #tpu.core_type<tc>, window_params = [{transform_indices = @transform_0, window_bounds = array<i64: 1, 8, 96>}, {transform_indices = @transform_1, window_bounds = array<i64: 1, 1, 8>}, {transform_indices = @transform_2, window_bounds = array<i64: 1, 8, 32>}]} {
    %c0 = arith.constant 0 : index
    %c0_0 = arith.constant 0 : index
    %c0_1 = arith.constant 0 : index
    %0 = vector.load %arg1[%c0, %c0_0, %c0_1] : memref<1x8x96xf32, #tpu.memory_space<vmem>>, vector<1x8x96xf32>
    %1 = vector.shape_cast %0 : vector<1x8x96xf32> to vector<8x96xf32>
    %c0_2 = arith.constant 0 : index
    %c0_3 = arith.constant 0 : index
    %c0_4 = arith.constant 0 : index
    %2 = vector.load %arg2[%c0_2, %c0_3, %c0_4] : memref<1x1x8xf32, #tpu.memory_space<vmem>>, vector<1x1x8xf32>
    %3 = vector.shape_cast %2 : vector<1x1x8xf32> to vector<1x8xf32>
    %4 = vector.extract_strided_slice %1 {offsets = [0, 0], sizes = [8, 8], strides = [1, 1]} : vector<8x96xf32> to vector<8x8xf32>
    %cst = arith.constant 0.353553385 : f32
    %5 = vector.broadcast %cst : f32 to vector<8x8xf32>
    %6 = arith.mulf %4, %5 : vector<8x8xf32>
    %7 = vector.extract_strided_slice %1 {offsets = [0, 32], sizes = [8, 8], strides = [1, 1]} : vector<8x96xf32> to vector<8x8xf32>
    %8 = vector.extract_strided_slice %1 {offsets = [0, 64], sizes = [8, 8], strides = [1, 1]} : vector<8x96xf32> to vector<8x8xf32>
    %cst_5 = arith.constant dense<0.000000e+00> : vector<8x8xf32>
    %9 = tpu.matmul %6, %7, %cst_5 {dimension_numbers = #tpu.dot_dimension_numbers<[1], [1], [0], [0], [0, 0, 1, 0], [], []>} : vector<8x8xf32>, vector<8x8xf32>, vector<8x8xf32> -> vector<8x8xf32>
    %10 = vector.broadcast %3 : vector<1x8xf32> to vector<8x8xf32>
    %11 = arith.addf %9, %10 : vector<8x8xf32>
    %cst_6 = arith.constant dense<0xFF800000> : vector<8xf32>
    %12 = vector.multi_reduction <maximumf>, %11, %cst_6 [1] : vector<8x8xf32> to vector<8xf32>
    %13 = vector.shape_cast %12 : vector<8xf32> to vector<8x1xf32>
    %14 = vector.broadcast %13 : vector<8x1xf32> to vector<8x8xf32>
    %15 = arith.subf %11, %14 : vector<8x8xf32>
    %16 = math.exp %15 : vector<8x8xf32>
    %cst_7 = arith.constant dense<0.000000e+00> : vector<8xf32>
    %17 = vector.multi_reduction <add>, %16, %cst_7 [1] : vector<8x8xf32> to vector<8xf32>
    %18 = vector.shape_cast %17 : vector<8xf32> to vector<8x1xf32>
    %19 = tpu.reciprocal %18 : vector<8x1xf32> -> vector<8x1xf32>
    %20 = vector.broadcast %19 : vector<8x1xf32> to vector<8x8xf32>
    %21 = arith.mulf %16, %20 : vector<8x8xf32>
    %cst_8 = arith.constant dense<0.000000e+00> : vector<8x8xf32>
    %22 = tpu.matmul %21, %8, %cst_8 {dimension_numbers = #tpu.dot_dimension_numbers<[1], [0], [0], [1], [0, 0, 1, 1], [], []>} : vector<8x8xf32>, vector<8x8xf32>, vector<8x8xf32> -> vector<8x8xf32>
    %23 = vector.extract_strided_slice %1 {offsets = [0, 8], sizes = [8, 8], strides = [1, 1]} : vector<8x96xf32> to vector<8x8xf32>
    %cst_9 = arith.constant 0.353553385 : f32
    %24 = vector.broadcast %cst_9 : f32 to vector<8x8xf32>
    %25 = arith.mulf %23, %24 : vector<8x8xf32>
    %26 = vector.extract_strided_slice %1 {offsets = [0, 40], sizes = [8, 8], strides = [1, 1]} : vector<8x96xf32> to vector<8x8xf32>
    %27 = vector.extract_strided_slice %1 {offsets = [0, 72], sizes = [8, 8], strides = [1, 1]} : vector<8x96xf32> to vector<8x8xf32>
    %cst_10 = arith.constant dense<0.000000e+00> : vector<8x8xf32>
    %28 = tpu.matmul %25, %26, %cst_10 {dimension_numbers = #tpu.dot_dimension_numbers<[1], [1], [0], [0], [0, 0, 1, 0], [], []>} : vector<8x8xf32>, vector<8x8xf32>, vector<8x8xf32> -> vector<8x8xf32>
    %29 = vector.broadcast %3 : vector<1x8xf32> to vector<8x8xf32>
    %30 = arith.addf %28, %29 : vector<8x8xf32>
    %cst_11 = arith.constant dense<0xFF800000> : vector<8xf32>
    %31 = vector.multi_reduction <maximumf>, %30, %cst_11 [1] : vector<8x8xf32> to vector<8xf32>
    %32 = vector.shape_cast %31 : vector<8xf32> to vector<8x1xf32>
    %33 = vector.broadcast %32 : vector<8x1xf32> to vector<8x8xf32>
    %34 = arith.subf %30, %33 : vector<8x8xf32>
    %35 = math.exp %34 : vector<8x8xf32>
    %cst_12 = arith.constant dense<0.000000e+00> : vector<8xf32>
    %36 = vector.multi_reduction <add>, %35, %cst_12 [1] : vector<8x8xf32> to vector<8xf32>
    %37 = vector.shape_cast %36 : vector<8xf32> to vector<8x1xf32>
    %38 = tpu.reciprocal %37 : vector<8x1xf32> -> vector<8x1xf32>
    %39 = vector.broadcast %38 : vector<8x1xf32> to vector<8x8xf32>
    %40 = arith.mulf %35, %39 : vector<8x8xf32>
    %cst_13 = arith.constant dense<0.000000e+00> : vector<8x8xf32>
    %41 = tpu.matmul %40, %27, %cst_13 {dimension_numbers = #tpu.dot_dimension_numbers<[1], [0], [0], [1], [0, 0, 1, 1], [], []>} : vector<8x8xf32>, vector<8x8xf32>, vector<8x8xf32> -> vector<8x8xf32>
    %42 = vector.extract_strided_slice %1 {offsets = [0, 16], sizes = [8, 8], strides = [1, 1]} : vector<8x96xf32> to vector<8x8xf32>
    %cst_14 = arith.constant 0.353553385 : f32
    %43 = vector.broadcast %cst_14 : f32 to vector<8x8xf32>
    %44 = arith.mulf %42, %43 : vector<8x8xf32>
    %45 = vector.extract_strided_slice %1 {offsets = [0, 48], sizes = [8, 8], strides = [1, 1]} : vector<8x96xf32> to vector<8x8xf32>
    %46 = vector.extract_strided_slice %1 {offsets = [0, 80], sizes = [8, 8], strides = [1, 1]} : vector<8x96xf32> to vector<8x8xf32>
    %cst_15 = arith.constant dense<0.000000e+00> : vector<8x8xf32>
    %47 = tpu.matmul %44, %45, %cst_15 {dimension_numbers = #tpu.dot_dimension_numbers<[1], [1], [0], [0], [0, 0, 1, 0], [], []>} : vector<8x8xf32>, vector<8x8xf32>, vector<8x8xf32> -> vector<8x8xf32>
    %48 = vector.broadcast %3 : vector<1x8xf32> to vector<8x8xf32>
    %49 = arith.addf %47, %48 : vector<8x8xf32>
    %cst_16 = arith.constant dense<0xFF800000> : vector<8xf32>
    %50 = vector.multi_reduction <maximumf>, %49, %cst_16 [1] : vector<8x8xf32> to vector<8xf32>
    %51 = vector.shape_cast %50 : vector<8xf32> to vector<8x1xf32>
    %52 = vector.broadcast %51 : vector<8x1xf32> to vector<8x8xf32>
    %53 = arith.subf %49, %52 : vector<8x8xf32>
    %54 = math.exp %53 : vector<8x8xf32>
    %cst_17 = arith.constant dense<0.000000e+00> : vector<8xf32>
    %55 = vector.multi_reduction <add>, %54, %cst_17 [1] : vector<8x8xf32> to vector<8xf32>
    %56 = vector.shape_cast %55 : vector<8xf32> to vector<8x1xf32>
    %57 = tpu.reciprocal %56 : vector<8x1xf32> -> vector<8x1xf32>
    %58 = vector.broadcast %57 : vector<8x1xf32> to vector<8x8xf32>
    %59 = arith.mulf %54, %58 : vector<8x8xf32>
    %cst_18 = arith.constant dense<0.000000e+00> : vector<8x8xf32>
    %60 = tpu.matmul %59, %46, %cst_18 {dimension_numbers = #tpu.dot_dimension_numbers<[1], [0], [0], [1], [0, 0, 1, 1], [], []>} : vector<8x8xf32>, vector<8x8xf32>, vector<8x8xf32> -> vector<8x8xf32>
    %61 = vector.extract_strided_slice %1 {offsets = [0, 24], sizes = [8, 8], strides = [1, 1]} : vector<8x96xf32> to vector<8x8xf32>
    %cst_19 = arith.constant 0.353553385 : f32
    %62 = vector.broadcast %cst_19 : f32 to vector<8x8xf32>
    %63 = arith.mulf %61, %62 : vector<8x8xf32>
    %64 = vector.extract_strided_slice %1 {offsets = [0, 56], sizes = [8, 8], strides = [1, 1]} : vector<8x96xf32> to vector<8x8xf32>
    %65 = vector.extract_strided_slice %1 {offsets = [0, 88], sizes = [8, 8], strides = [1, 1]} : vector<8x96xf32> to vector<8x8xf32>
    %cst_20 = arith.constant dense<0.000000e+00> : vector<8x8xf32>
    %66 = tpu.matmul %63, %64, %cst_20 {dimension_numbers = #tpu.dot_dimension_numbers<[1], [1], [0], [0], [0, 0, 1, 0], [], []>} : vector<8x8xf32>, vector<8x8xf32>, vector<8x8xf32> -> vector<8x8xf32>
    %67 = vector.broadcast %3 : vector<1x8xf32> to vector<8x8xf32>
    %68 = arith.addf %66, %67 : vector<8x8xf32>
    %cst_21 = arith.constant dense<0xFF800000> : vector<8xf32>
    %69 = vector.multi_reduction <maximumf>, %68, %cst_21 [1] : vector<8x8xf32> to vector<8xf32>
    %70 = vector.shape_cast %69 : vector<8xf32> to vector<8x1xf32>
    %71 = vector.broadcast %70 : vector<8x1xf32> to vector<8x8xf32>
    %72 = arith.subf %68, %71 : vector<8x8xf32>
    %73 = math.exp %72 : vector<8x8xf32>
    %cst_22 = arith.constant dense<0.000000e+00> : vector<8xf32>
    %74 = vector.multi_reduction <add>, %73, %cst_22 [1] : vector<8x8xf32> to vector<8xf32>
    %75 = vector.shape_cast %74 : vector<8xf32> to vector<8x1xf32>
    %76 = tpu.reciprocal %75 : vector<8x1xf32> -> vector<8x1xf32>
    %77 = vector.broadcast %76 : vector<8x1xf32> to vector<8x8xf32>
    %78 = arith.mulf %73, %77 : vector<8x8xf32>
    %cst_23 = arith.constant dense<0.000000e+00> : vector<8x8xf32>
    %79 = tpu.matmul %78, %65, %cst_23 {dimension_numbers = #tpu.dot_dimension_numbers<[1], [0], [0], [1], [0, 0, 1, 1], [], []>} : vector<8x8xf32>, vector<8x8xf32>, vector<8x8xf32> -> vector<8x8xf32>
    %80 = tpu.concatenate %22, %41, %60, %79 in 1 : vector<8x8xf32>, vector<8x8xf32>, vector<8x8xf32>, vector<8x8xf32> -> vector<8x32xf32>
    %c0_24 = arith.constant 0 : index
    %c0_25 = arith.constant 0 : index
    %c0_26 = arith.constant 0 : index
    %81 = vector.load %arg3[%c0_24, %c0_25, %c0_26] : memref<1x8x32xf32, #tpu.memory_space<vmem>>, vector<1x8x32xf32>
    %82 = vector.shape_cast %81 : vector<1x8x32xf32> to vector<8x32xf32>
    %83 = vector.shape_cast %80 : vector<8x32xf32> to vector<1x8x32xf32>
    tpu.vector_store %arg3[%c0_24, %c0_25, %c0_26], %83 {strides = array<i32>} : memref<1x8x32xf32, #tpu.memory_space<vmem>>, vector<1x8x32xf32>,
    return
  }
  func.func @transform_0(%arg0: i32) -> (i32, i32, i32) {
    %c0_i32 = arith.constant 0 : i32
    %c0_i32_0 = arith.constant 0 : i32
    %c0_i32_1 = arith.constant 0 : i32
    return %arg0, %c0_i32, %c0_i32_0 : i32, i32, i32
  }
  func.func @transform_1(%arg0: i32) -> (i32, i32, i32) {
    %c0_i32 = arith.constant 0 : i32
    %c0_i32_0 = arith.constant 0 : i32
    %c0_i32_1 = arith.constant 0 : i32
    return %arg0, %c0_i32, %c0_i32_0 : i32, i32, i32
  }
  func.func @transform_2(%arg0: i32) -> (i32, i32, i32) {
    %c0_i32 = arith.constant 0 : i32
    %c0_i32_0 = arith.constant 0 : i32
    %c0_i32_1 = arith.constant 0 : i32
    return %arg0, %c0_i32, %c0_i32_0 : i32, i32, i32
  }
}

module attributes {stable_mosaic.version = 11 : i64} {
  func.func @_linear_kernel(%arg0: i32, %arg1: i32, %arg2: i32, %arg3: memref<16x32xf32, #tpu.memory_space<vmem>>, %arg4: memref<32x32xf32, #tpu.memory_space<vmem>>, %arg5: memref<1x32xf32, #tpu.memory_space<vmem>>, %arg6: memref<16x32xf32, #tpu.memory_space<vmem>>, %arg7: memref<16x32xf32, #tpu.memory_space<vmem>>, %arg8: memref<16x32xf32, #tpu.memory_space<vmem>>) attributes {dimension_semantics = [#tpu.dimension_semantics<parallel>, #tpu.dimension_semantics<parallel>, #tpu.dimension_semantics<arbitrary>], iteration_bounds = array<i64: 1, 1, 1>, scalar_prefetch = 0 : i64, scratch_operands = 1 : i64, tpu.core_type = #tpu.core_type<tc>, window_params = [{transform_indices = @transform_0, window_bounds = array<i64: 16, 32>}, {transform_indices = @transform_1, window_bounds = array<i64: 32, 32>}, {transform_indices = @transform_2, window_bounds = array<i64: 1, 32>}, {transform_indices = @transform_3, window_bounds = array<i64: 16, 32>}, {transform_indices = @transform_4, window_bounds = array<i64: 16, 32>}]} {
    %c0_i32 = arith.constant 0 : i32
    %0 = arith.cmpi eq, %arg2, %c0_i32 : i32
    %1 = arith.extui %0 : i1 to i32
    %c0_i32_0 = arith.constant 0 : i32
    %2 = arith.cmpi ne, %1, %c0_i32_0 : i32
    scf.if %2 {
      %cst_10 = arith.constant 0.000000e+00 : f32
      %12 = vector.broadcast %cst_10 : f32 to vector<16x32xf32>
      %c0_11 = arith.constant 0 : index
      %c0_12 = arith.constant 0 : index
      %13 = vector.load %arg8[%c0_11, %c0_12] : memref<16x32xf32, #tpu.memory_space<vmem>>, vector<16x32xf32>
      tpu.vector_store %arg8[%c0_11, %c0_12], %12 {strides = array<i32>} : memref<16x32xf32, #tpu.memory_space<vmem>>, vector<16x32xf32>,
    } else {
    }
    %c0 = arith.constant 0 : index
    %c0_1 = arith.constant 0 : index
    %3 = vector.load %arg8[%c0, %c0_1] : memref<16x32xf32, #tpu.memory_space<vmem>>, vector<16x32xf32>
    %c0_2 = arith.constant 0 : index
    %c0_3 = arith.constant 0 : index
    %4 = vector.load %arg3[%c0_2, %c0_3] : memref<16x32xf32, #tpu.memory_space<vmem>>, vector<16x32xf32>
    %c0_4 = arith.constant 0 : index
    %c0_5 = arith.constant 0 : index
    %5 = vector.load %arg4[%c0_4, %c0_5] : memref<32x32xf32, #tpu.memory_space<vmem>>, vector<32x32xf32>
    %cst = arith.constant dense<0.000000e+00> : vector<16x32xf32>
    %6 = tpu.matmul %4, %5, %cst {dimension_numbers = #tpu.dot_dimension_numbers<[1], [0], [0], [1], [0, 0, 1, 1], [], []>} : vector<16x32xf32>, vector<32x32xf32>, vector<16x32xf32> -> vector<16x32xf32>
    %7 = arith.addf %3, %6 : vector<16x32xf32>
    %c0_6 = arith.constant 0 : index
    %c0_7 = arith.constant 0 : index
    %8 = vector.load %arg8[%c0_6, %c0_7] : memref<16x32xf32, #tpu.memory_space<vmem>>, vector<16x32xf32>
    tpu.vector_store %arg8[%c0_6, %c0_7], %7 {strides = array<i32>} : memref<16x32xf32, #tpu.memory_space<vmem>>, vector<16x32xf32>,
    %c0_i32_8 = arith.constant 0 : i32
    %9 = arith.cmpi eq, %arg2, %c0_i32_8 : i32
    %10 = arith.extui %9 : i1 to i32
    %c0_i32_9 = arith.constant 0 : i32
    %11 = arith.cmpi ne, %10, %c0_i32_9 : i32
    scf.if %11 {
      %c0_10 = arith.constant 0 : index
      %c0_11 = arith.constant 0 : index
      %12 = vector.load %arg8[%c0_10, %c0_11] : memref<16x32xf32, #tpu.memory_space<vmem>>, vector<16x32xf32>
      %c0_12 = arith.constant 0 : index
      %c0_13 = arith.constant 0 : index
      %13 = vector.load %arg5[%c0_12, %c0_13] : memref<1x32xf32, #tpu.memory_space<vmem>>, vector<1x32xf32>
      %14 = vector.broadcast %13 : vector<1x32xf32> to vector<16x32xf32>
      %15 = arith.addf %12, %14 : vector<16x32xf32>
      %c0_14 = arith.constant 0 : index
      %c0_15 = arith.constant 0 : index
      %16 = vector.load %arg6[%c0_14, %c0_15] : memref<16x32xf32, #tpu.memory_space<vmem>>, vector<16x32xf32>
      %17 = arith.addf %15, %16 : vector<16x32xf32>
      %c0_16 = arith.constant 0 : index
      %c0_17 = arith.constant 0 : index
      %18 = vector.load %arg7[%c0_16, %c0_17] : memref<16x32xf32, #tpu.memory_space<vmem>>, vector<16x32xf32>
      tpu.vector_store %arg7[%c0_16, %c0_17], %17 {strides = array<i32>} : memref<16x32xf32, #tpu.memory_space<vmem>>, vector<16x32xf32>,
    } else {
    }
    return
  }
  func.func @transform_0(%arg0: i32, %arg1: i32, %arg2: i32) -> (i32, i32) {
    %c0_i32 = arith.constant 0 : i32
    return %arg0, %arg2 : i32, i32
  }
  func.func @transform_1(%arg0: i32, %arg1: i32, %arg2: i32) -> (i32, i32) {
    %c0_i32 = arith.constant 0 : i32
    return %arg2, %arg1 : i32, i32
  }
  func.func @transform_2(%arg0: i32, %arg1: i32, %arg2: i32) -> (i32, i32) {
    %c0_i32 = arith.constant 0 : i32
    %c0_i32_0 = arith.constant 0 : i32
    return %c0_i32, %arg1 : i32, i32
  }
  func.func @transform_3(%arg0: i32, %arg1: i32, %arg2: i32) -> (i32, i32) {
    %c0_i32 = arith.constant 0 : i32
    return %arg0, %arg1 : i32, i32
  }
  func.func @transform_4(%arg0: i32, %arg1: i32, %arg2: i32) -> (i32, i32) {
    %c0_i32 = arith.constant 0 : i32
    return %arg0, %arg1 : i32, i32
  }
}

module attributes {stable_mosaic.version = 11 : i64} {
  func.func @_linear_kernel(%arg0: i32, %arg1: i32, %arg2: i32, %arg3: memref<16x32xf32, #tpu.memory_space<vmem>>, %arg4: memref<32x128xf32, #tpu.memory_space<vmem>>, %arg5: memref<1x128xf32, #tpu.memory_space<vmem>>, %arg6: memref<16x128xf32, #tpu.memory_space<vmem>>, %arg7: memref<16x128xf32, #tpu.memory_space<vmem>>) attributes {dimension_semantics = [#tpu.dimension_semantics<parallel>, #tpu.dimension_semantics<parallel>, #tpu.dimension_semantics<arbitrary>], iteration_bounds = array<i64: 1, 1, 1>, scalar_prefetch = 0 : i64, scratch_operands = 1 : i64, tpu.core_type = #tpu.core_type<tc>, window_params = [{transform_indices = @transform_0, window_bounds = array<i64: 16, 32>}, {transform_indices = @transform_1, window_bounds = array<i64: 32, 128>}, {transform_indices = @transform_2, window_bounds = array<i64: 1, 128>}, {transform_indices = @transform_3, window_bounds = array<i64: 16, 128>}]} {
    %c0_i32 = arith.constant 0 : i32
    %0 = arith.cmpi eq, %arg2, %c0_i32 : i32
    %1 = arith.extui %0 : i1 to i32
    %c0_i32_0 = arith.constant 0 : i32
    %2 = arith.cmpi ne, %1, %c0_i32_0 : i32
    scf.if %2 {
      %cst_10 = arith.constant 0.000000e+00 : f32
      %12 = vector.broadcast %cst_10 : f32 to vector<16x128xf32>
      %c0_11 = arith.constant 0 : index
      %c0_12 = arith.constant 0 : index
      %13 = vector.load %arg7[%c0_11, %c0_12] : memref<16x128xf32, #tpu.memory_space<vmem>>, vector<16x128xf32>
      tpu.vector_store %arg7[%c0_11, %c0_12], %12 {strides = array<i32>} : memref<16x128xf32, #tpu.memory_space<vmem>>, vector<16x128xf32>,
    } else {
    }
    %c0 = arith.constant 0 : index
    %c0_1 = arith.constant 0 : index
    %3 = vector.load %arg7[%c0, %c0_1] : memref<16x128xf32, #tpu.memory_space<vmem>>, vector<16x128xf32>
    %c0_2 = arith.constant 0 : index
    %c0_3 = arith.constant 0 : index
    %4 = vector.load %arg3[%c0_2, %c0_3] : memref<16x32xf32, #tpu.memory_space<vmem>>, vector<16x32xf32>
    %c0_4 = arith.constant 0 : index
    %c0_5 = arith.constant 0 : index
    %5 = vector.load %arg4[%c0_4, %c0_5] : memref<32x128xf32, #tpu.memory_space<vmem>>, vector<32x128xf32>
    %cst = arith.constant dense<0.000000e+00> : vector<16x128xf32>
    %6 = tpu.matmul %4, %5, %cst {dimension_numbers = #tpu.dot_dimension_numbers<[1], [0], [0], [1], [0, 0, 1, 1], [], []>} : vector<16x32xf32>, vector<32x128xf32>, vector<16x128xf32> -> vector<16x128xf32>
    %7 = arith.addf %3, %6 : vector<16x128xf32>
    %c0_6 = arith.constant 0 : index
    %c0_7 = arith.constant 0 : index
    %8 = vector.load %arg7[%c0_6, %c0_7] : memref<16x128xf32, #tpu.memory_space<vmem>>, vector<16x128xf32>
    tpu.vector_store %arg7[%c0_6, %c0_7], %7 {strides = array<i32>} : memref<16x128xf32, #tpu.memory_space<vmem>>, vector<16x128xf32>,
    %c0_i32_8 = arith.constant 0 : i32
    %9 = arith.cmpi eq, %arg2, %c0_i32_8 : i32
    %10 = arith.extui %9 : i1 to i32
    %c0_i32_9 = arith.constant 0 : i32
    %11 = arith.cmpi ne, %10, %c0_i32_9 : i32
    scf.if %11 {
      %c0_10 = arith.constant 0 : index
      %c0_11 = arith.constant 0 : index
      %12 = vector.load %arg7[%c0_10, %c0_11] : memref<16x128xf32, #tpu.memory_space<vmem>>, vector<16x128xf32>
      %c0_12 = arith.constant 0 : index
      %c0_13 = arith.constant 0 : index
      %13 = vector.load %arg5[%c0_12, %c0_13] : memref<1x128xf32, #tpu.memory_space<vmem>>, vector<1x128xf32>
      %14 = vector.broadcast %13 : vector<1x128xf32> to vector<16x128xf32>
      %15 = arith.addf %12, %14 : vector<16x128xf32>
      %cst_14 = arith.constant 0.000000e+00 : f32
      %16 = vector.broadcast %cst_14 : f32 to vector<16x128xf32>
      %17 = arith.maximumf %15, %16 : vector<16x128xf32>
      %c0_15 = arith.constant 0 : index
      %c0_16 = arith.constant 0 : index
      %18 = vector.load %arg6[%c0_15, %c0_16] : memref<16x128xf32, #tpu.memory_space<vmem>>, vector<16x128xf32>
      tpu.vector_store %arg6[%c0_15, %c0_16], %17 {strides = array<i32>} : memref<16x128xf32, #tpu.memory_space<vmem>>, vector<16x128xf32>,
    } else {
    }
    return
  }
  func.func @transform_0(%arg0: i32, %arg1: i32, %arg2: i32) -> (i32, i32) {
    %c0_i32 = arith.constant 0 : i32
    return %arg0, %arg2 : i32, i32
  }
  func.func @transform_1(%arg0: i32, %arg1: i32, %arg2: i32) -> (i32, i32) {
    %c0_i32 = arith.constant 0 : i32
    return %arg2, %arg1 : i32, i32
  }
  func.func @transform_2(%arg0: i32, %arg1: i32, %arg2: i32) -> (i32, i32) {
    %c0_i32 = arith.constant 0 : i32
    %c0_i32_0 = arith.constant 0 : i32
    return %c0_i32, %arg1 : i32, i32
  }
  func.func @transform_3(%arg0: i32, %arg1: i32, %arg2: i32) -> (i32, i32) {
    %c0_i32 = arith.constant 0 : i32
    return %arg0, %arg1 : i32, i32
  }
}

module attributes {stable_mosaic.version = 11 : i64} {
  func.func @_linear_kernel(%arg0: i32, %arg1: i32, %arg2: i32, %arg3: memref<16x128xf32, #tpu.memory_space<vmem>>, %arg4: memref<128x32xf32, #tpu.memory_space<vmem>>, %arg5: memref<1x32xf32, #tpu.memory_space<vmem>>, %arg6: memref<16x32xf32, #tpu.memory_space<vmem>>, %arg7: memref<16x32xf32, #tpu.memory_space<vmem>>, %arg8: memref<16x32xf32, #tpu.memory_space<vmem>>) attributes {dimension_semantics = [#tpu.dimension_semantics<parallel>, #tpu.dimension_semantics<parallel>, #tpu.dimension_semantics<arbitrary>], iteration_bounds = array<i64: 1, 1, 1>, scalar_prefetch = 0 : i64, scratch_operands = 1 : i64, tpu.core_type = #tpu.core_type<tc>, window_params = [{transform_indices = @transform_0, window_bounds = array<i64: 16, 128>}, {transform_indices = @transform_1, window_bounds = array<i64: 128, 32>}, {transform_indices = @transform_2, window_bounds = array<i64: 1, 32>}, {transform_indices = @transform_3, window_bounds = array<i64: 16, 32>}, {transform_indices = @transform_4, window_bounds = array<i64: 16, 32>}]} {
    %c0_i32 = arith.constant 0 : i32
    %0 = arith.cmpi eq, %arg2, %c0_i32 : i32
    %1 = arith.extui %0 : i1 to i32
    %c0_i32_0 = arith.constant 0 : i32
    %2 = arith.cmpi ne, %1, %c0_i32_0 : i32
    scf.if %2 {
      %cst_10 = arith.constant 0.000000e+00 : f32
      %12 = vector.broadcast %cst_10 : f32 to vector<16x32xf32>
      %c0_11 = arith.constant 0 : index
      %c0_12 = arith.constant 0 : index
      %13 = vector.load %arg8[%c0_11, %c0_12] : memref<16x32xf32, #tpu.memory_space<vmem>>, vector<16x32xf32>
      tpu.vector_store %arg8[%c0_11, %c0_12], %12 {strides = array<i32>} : memref<16x32xf32, #tpu.memory_space<vmem>>, vector<16x32xf32>,
    } else {
    }
    %c0 = arith.constant 0 : index
    %c0_1 = arith.constant 0 : index
    %3 = vector.load %arg8[%c0, %c0_1] : memref<16x32xf32, #tpu.memory_space<vmem>>, vector<16x32xf32>
    %c0_2 = arith.constant 0 : index
    %c0_3 = arith.constant 0 : index
    %4 = vector.load %arg3[%c0_2, %c0_3] : memref<16x128xf32, #tpu.memory_space<vmem>>, vector<16x128xf32>
    %c0_4 = arith.constant 0 : index
    %c0_5 = arith.constant 0 : index
    %5 = vector.load %arg4[%c0_4, %c0_5] : memref<128x32xf32, #tpu.memory_space<vmem>>, vector<128x32xf32>
    %cst = arith.constant dense<0.000000e+00> : vector<16x32xf32>
    %6 = tpu.matmul %4, %5, %cst {dimension_numbers = #tpu.dot_dimension_numbers<[1], [0], [0], [1], [0, 0, 1, 1], [], []>} : vector<16x128xf32>, vector<128x32xf32>, vector<16x32xf32> -> vector<16x32xf32>
    %7 = arith.addf %3, %6 : vector<16x32xf32>
    %c0_6 = arith.constant 0 : index
    %c0_7 = arith.constant 0 : index
    %8 = vector.load %arg8[%c0_6, %c0_7] : memref<16x32xf32, #tpu.memory_space<vmem>>, vector<16x32xf32>
    tpu.vector_store %arg8[%c0_6, %c0_7], %7 {strides = array<i32>} : memref<16x32xf32, #tpu.memory_space<vmem>>, vector<16x32xf32>,
    %c0_i32_8 = arith.constant 0 : i32
    %9 = arith.cmpi eq, %arg2, %c0_i32_8 : i32
    %10 = arith.extui %9 : i1 to i32
    %c0_i32_9 = arith.constant 0 : i32
    %11 = arith.cmpi ne, %10, %c0_i32_9 : i32
    scf.if %11 {
      %c0_10 = arith.constant 0 : index
      %c0_11 = arith.constant 0 : index
      %12 = vector.load %arg8[%c0_10, %c0_11] : memref<16x32xf32, #tpu.memory_space<vmem>>, vector<16x32xf32>
      %c0_12 = arith.constant 0 : index
      %c0_13 = arith.constant 0 : index
      %13 = vector.load %arg5[%c0_12, %c0_13] : memref<1x32xf32, #tpu.memory_space<vmem>>, vector<1x32xf32>
      %14 = vector.broadcast %13 : vector<1x32xf32> to vector<16x32xf32>
      %15 = arith.addf %12, %14 : vector<16x32xf32>
      %c0_14 = arith.constant 0 : index
      %c0_15 = arith.constant 0 : index
      %16 = vector.load %arg6[%c0_14, %c0_15] : memref<16x32xf32, #tpu.memory_space<vmem>>, vector<16x32xf32>
      %17 = arith.addf %15, %16 : vector<16x32xf32>
      %c0_16 = arith.constant 0 : index
      %c0_17 = arith.constant 0 : index
      %18 = vector.load %arg7[%c0_16, %c0_17] : memref<16x32xf32, #tpu.memory_space<vmem>>, vector<16x32xf32>
      tpu.vector_store %arg7[%c0_16, %c0_17], %17 {strides = array<i32>} : memref<16x32xf32, #tpu.memory_space<vmem>>, vector<16x32xf32>,
    } else {
    }
    return
  }
  func.func @transform_0(%arg0: i32, %arg1: i32, %arg2: i32) -> (i32, i32) {
    %c0_i32 = arith.constant 0 : i32
    return %arg0, %arg2 : i32, i32
  }
  func.func @transform_1(%arg0: i32, %arg1: i32, %arg2: i32) -> (i32, i32) {
    %c0_i32 = arith.constant 0 : i32
    return %arg2, %arg1 : i32, i32
  }
  func.func @transform_2(%arg0: i32, %arg1: i32, %arg2: i32) -> (i32, i32) {
    %c0_i32 = arith.constant 0 : i32
    %c0_i32_0 = arith.constant 0 : i32
    return %c0_i32, %arg1 : i32, i32
  }
  func.func @transform_3(%arg0: i32, %arg1: i32, %arg2: i32) -> (i32, i32) {
    %c0_i32 = arith.constant 0 : i32
    return %arg0, %arg1 : i32, i32
  }
  func.func @transform_4(%arg0: i32, %arg1: i32, %arg2: i32) -> (i32, i32) {
    %c0_i32 = arith.constant 0 : i32
    return %arg0, %arg1 : i32, i32
  }
}

module attributes {stable_mosaic.version = 11 : i64} {
  func.func @_linear_kernel(%arg0: i32, %arg1: i32, %arg2: i32, %arg3: memref<16x128xf32, #tpu.memory_space<vmem>>, %arg4: memref<128x32xf32, #tpu.memory_space<vmem>>, %arg5: memref<1x32xf32, #tpu.memory_space<vmem>>, %arg6: memref<16x32xf32, #tpu.memory_space<vmem>>, %arg7: memref<16x32xf32, #tpu.memory_space<vmem>>, %arg8: memref<16x32xf32, #tpu.memory_space<vmem>>) attributes {dimension_semantics = [#tpu.dimension_semantics<parallel>, #tpu.dimension_semantics<parallel>, #tpu.dimension_semantics<arbitrary>], iteration_bounds = array<i64: 1, 1, 1>, scalar_prefetch = 0 : i64, scratch_operands = 1 : i64, tpu.core_type = #tpu.core_type<tc>, window_params = [{transform_indices = @transform_0, window_bounds = array<i64: 16, 128>}, {transform_indices = @transform_1, window_bounds = array<i64: 128, 32>}, {transform_indices = @transform_2, window_bounds = array<i64: 1, 32>}, {transform_indices = @transform_3, window_bounds = array<i64: 16, 32>}, {transform_indices = @transform_4, window_bounds = array<i64: 16, 32>}]} {
    %c0_i32 = arith.constant 0 : i32
    %0 = arith.cmpi eq, %arg2, %c0_i32 : i32
    %1 = arith.extui %0 : i1 to i32
    %c0_i32_0 = arith.constant 0 : i32
    %2 = arith.cmpi ne, %1, %c0_i32_0 : i32
    scf.if %2 {
      %cst_10 = arith.constant 0.000000e+00 : f32
      %12 = vector.broadcast %cst_10 : f32 to vector<16x32xf32>
      %c0_11 = arith.constant 0 : index
      %c0_12 = arith.constant 0 : index
      %13 = vector.load %arg8[%c0_11, %c0_12] : memref<16x32xf32, #tpu.memory_space<vmem>>, vector<16x32xf32>
      tpu.vector_store %arg8[%c0_11, %c0_12], %12 {strides = array<i32>} : memref<16x32xf32, #tpu.memory_space<vmem>>, vector<16x32xf32>,
    } else {
    }
    %c0 = arith.constant 0 : index
    %c0_1 = arith.constant 0 : index
    %3 = vector.load %arg8[%c0, %c0_1] : memref<16x32xf32, #tpu.memory_space<vmem>>, vector<16x32xf32>
    %c0_2 = arith.constant 0 : index
    %c0_3 = arith.constant 0 : index
    %4 = vector.load %arg3[%c0_2, %c0_3] : memref<16x128xf32, #tpu.memory_space<vmem>>, vector<16x128xf32>
    %c0_4 = arith.constant 0 : index
    %c0_5 = arith.constant 0 : index
    %5 = vector.load %arg4[%c0_4, %c0_5] : memref<128x32xf32, #tpu.memory_space<vmem>>, vector<128x32xf32>
    %cst = arith.constant dense<0.000000e+00> : vector<16x32xf32>
    %6 = tpu.matmul %4, %5, %cst {dimension_numbers = #tpu.dot_dimension_numbers<[1], [0], [0], [1], [0, 0, 1, 1], [], []>} : vector<16x128xf32>, vector<128x32xf32>, vector<16x32xf32> -> vector<16x32xf32>
    %7 = arith.addf %3, %6 : vector<16x32xf32>
    %c0_6 = arith.constant 0 : index
    %c0_7 = arith.constant 0 : index
    %8 = vector.load %arg8[%c0_6, %c0_7] : memref<16x32xf32, #tpu.memory_space<vmem>>, vector<16x32xf32>
    tpu.vector_store %arg8[%c0_6, %c0_7], %7 {strides = array<i32>} : memref<16x32xf32, #tpu.memory_space<vmem>>, vector<16x32xf32>,
    %c0_i32_8 = arith.constant 0 : i32
    %9 = arith.cmpi eq, %arg2, %c0_i32_8 : i32
    %10 = arith.extui %9 : i1 to i32
    %c0_i32_9 = arith.constant 0 : i32
    %11 = arith.cmpi ne, %10, %c0_i32_9 : i32
    scf.if %11 {
      %c0_10 = arith.constant 0 : index
      %c0_11 = arith.constant 0 : index
      %12 = vector.load %arg8[%c0_10, %c0_11] : memref<16x32xf32, #tpu.memory_space<vmem>>, vector<16x32xf32>
      %c0_12 = arith.constant 0 : index
      %c0_13 = arith.constant 0 : index
      %13 = vector.load %arg5[%c0_12, %c0_13] : memref<1x32xf32, #tpu.memory_space<vmem>>, vector<1x32xf32>
      %14 = vector.broadcast %13 : vector<1x32xf32> to vector<16x32xf32>
      %15 = arith.addf %12, %14 : vector<16x32xf32>
      %c0_14 = arith.constant 0 : index
      %c0_15 = arith.constant 0 : index
      %16 = vector.load %arg6[%c0_14, %c0_15] : memref<16x32xf32, #tpu.memory_space<vmem>>, vector<16x32xf32>
      %17 = arith.addf %15, %16 : vector<16x32xf32>
      %c0_16 = arith.constant 0 : index
      %c0_17 = arith.constant 0 : index
      %18 = vector.load %arg7[%c0_16, %c0_17] : memref<16x32xf32, #tpu.memory_space<vmem>>, vector<16x32xf32>
      tpu.vector_store %arg7[%c0_16, %c0_17], %17 {strides = array<i32>} : memref<16x32xf32, #tpu.memory_space<vmem>>, vector<16x32xf32>,
    } else {
    }
    return
  }
  func.func @transform_0(%arg0: i32, %arg1: i32, %arg2: i32) -> (i32, i32) {
    %c0_i32 = arith.constant 0 : i32
    return %arg0, %arg2 : i32, i32
  }
  func.func @transform_1(%arg0: i32, %arg1: i32, %arg2: i32) -> (i32, i32) {
    %c0_i32 = arith.constant 0 : i32
    return %arg2, %arg1 : i32, i32
  }
  func.func @transform_2(%arg0: i32, %arg1: i32, %arg2: i32) -> (i32, i32) {
    %c0_i32 = arith.constant 0 : i32
    %c0_i32_0 = arith.constant 0 : i32
    return %c0_i32, %arg1 : i32, i32
  }
  func.func @transform_3(%arg0: i32, %arg1: i32, %arg2: i32) -> (i32, i32) {
    %c0_i32 = arith.constant 0 : i32
    return %arg0, %arg1 : i32, i32
  }
  func.func @transform_4(%arg0: i32, %arg1: i32, %arg2: i32) -> (i32, i32) {
    %c0_i32 = arith.constant 0 : i32
    return %arg0, %arg1 : i32, i32
  }
}

</mosaic_0001>

<bundles_post_ra>
// kernel: encoder_forward.14
= control target key start
LH: loop header
LB: loop body
LE: loop exit
PB: predicated region body
PF: predicated region fallthrough
CT: control target
= control target key end

     0   :  { %vm16_vm0 = vcmask 261120   ;;  %s118_s0 = inlined_call_operand.vmem [shape: f32[16,32], index: 0, kind: input, shape index: {}]   ;;  %s119_s1 = inlined_call_operand.vmem [shape: f32[1,32], index: 1, kind: input, shape index: {}]   ;;  %s120_s2 = inlined_call_operand.vmem [shape: f32[1,32], index: 2, kind: input, shape index: {}]   ;;  %s121_s3 = inlined_call_operand.vmem [shape: f32[16,32], index: 3, kind: output, shape index: {}]  }
   0x1   :  { %v14_v0 = vld [vmem:[%s118_s0] sm:$0xff]  ;;  %v15_v1 = vld [vmem:[%s118_s0 + $0x8] sm:$0xff] }
   0x2   :  { %v17_v2 = vsel %vm16_vm0, %v14_v0, 0.0  ;;  %v20_v3 = vsel %vm16_vm0, %v15_v1, 0.0  ;;  %v68_v20 = vld [vmem:[%s119_s1] ss:$0 sm:$0xff] }
   0x3   :  { %18 = vadd.xlane.f32.xlu0 %v17_v2  ;;  %v69_v23 = vld [vmem:[%s120_s2] ss:$0 sm:$0xff] }
   0x7   :  { %21 = vadd.xlane.f32.xlu0 %v20_v3 }
  0x8c   :  { %v19_v4 = vpop.xlane.xlu0 %18 }
  0x8d   :  { %v24_v5 = vmul.f32 0.03125, %v19_v4 }
  0x8f   :  { %v26_v6 = vsub.f32 %v14_v0, %v24_v5 }
  0x90   :  { %v22_v7 = vpop.xlane.xlu0 %21 }
  0x91   :  { %v25_v8 = vmul.f32 0.03125, %v22_v7  ;;  %v28_v9 = vmul.f32 %v26_v6, %v26_v6 }
  0x93   :  { %v27_v10 = vsub.f32 %v15_v1, %v25_v8  ;;  %v30_v11 = vsel %vm16_vm0, %v28_v9, 0.0 }
  0x94   :  { %31 = vadd.xlane.f32.xlu1 %v30_v11 }
  0x95   :  { %v29_v12 = vmul.f32 %v27_v10, %v27_v10 }
  0x97   :  { %v33_v13 = vsel %vm16_vm0, %v29_v12, 0.0 }
  0x98   :  { %34 = vadd.xlane.f32.xlu1 %v33_v13 }
 0x11d   :  { %v32_v14 = vpop.xlane.xlu1 %31 }
 0x11e   :  { %v36_v15 = vmul.f32 0.03125, %v32_v14 }
 0x120   :  { %v38_v16 = vadd.f32 1e-05, %v36_v15 }
 0x121   :  { %v35_v17 = vpop.xlane.xlu1 %34 }
 0x122   :  { %70 = vrsqrt.f32 %v38_v16  ;;  %v37_v18 = vmul.f32 0.03125, %v35_v17 }
 0x124   :  { %v39_v19 = vadd.f32 1e-05, %v37_v18 }
 0x126   :  { %72 = vrsqrt.f32 %v39_v19 }
 0x12f   :  { %v71_v21 = vpop.eup %70 }
 0x130   :  { %v49_v22 = vmul.f32 %v71_v21, %v68_v20 }
 0x132   :  { %v51_v24 = vmul.f32 %v49_v22, %v26_v6 }
 0x133   :  { %v73_v25 = vpop.eup %72 }
 0x134   :  { %v60_v26 = vadd.f32 %v69_v23, %v51_v24  ;;  %v50_v27 = vmul.f32 %v73_v25, %v68_v20 }
 0x136   :  { %62 = vst.msk [vmem:[%s121_s3] sm:$0xff] %vm16_vm0, %v60_v26  ;;  %v52_v28 = vmul.f32 %v50_v27, %v27_v10 }
 0x138   :  { %v61_v29 = vadd.f32 %v69_v23, %v52_v28 }
 0x13a   :  { %63 = vst.msk [vmem:[%s121_s3 + $0x8] sm:$0xff] %vm16_vm0, %v61_v29 }

// kernel: encoder_forward.15
= control target key start
LH: loop header
LB: loop body
LE: loop exit
PB: predicated region body
PF: predicated region fallthrough
CT: control target
= control target key end

     0   :  { %vm29_vm0 = vcmask 261120   ;;  %vm18_vm1 = vcmask 785408   ;;  %v157_v2 = vmov 0.0   ;;  %s213_s1 = inlined_call_operand.vmem [shape: f32[32,96], index: 1, kind: input, shape index: {}]   ;;  %s214_s0 = inlined_call_operand.vmem [shape: f32[16,32], index: 0, kind: input, shape index: {}]   ;;  %s215_s2 = inlined_call_operand.vmem [shape: f32[1,96], index: 2, kind: input, shape index: {}]   ;;  %s216_s3 = inlined_call_operand.vmem [shape: f32[16,96], index: 3, kind: output, shape index: {}]  }
   0x1   :  { %v28_v0 = vld [vmem:[%s213_s1 + $0x18] sm:$0xff]  ;;  %v27_v1 = vld [vmem:[%s213_s1 + $0x10] sm:$0xff]  ;;  %20 = vst.msk [vmem:[#allocation2 + $0x8] sm:$0xff] %vm18_vm1, %v157_v2  ;;  %19 = vst.msk [vmem:[#allocation2] sm:$0xff] %vm18_vm1, %v157_v2 }
   0x2   :  { %145 = vmatprep.subr.mxu0 %v28_v0  ;;  %v23_v3 = vld [vmem:[%s214_s0] sm:$0xff]  ;;  %v26_v4 = vld [vmem:[%s213_s1 + $0x8] sm:$0xff] }
   0x3   :  { %146 = vmatpush3.msra.mxu0 %v28_v0  ;;  %153 = vmatprep.mubr.msk.f32.mxu0 %vm29_vm0, %v23_v3  ;;  %v25_v5 = vld [vmem:[%s213_s1] sm:$0xff]  ;;  %v24_v6 = vld [vmem:[%s214_s0 + $0x8] sm:$0xff] }
   0x4   :  { %147 = vmatprep.subr.mxu0 %v27_v1  ;;  %v138_v13 = vld [vmem:[%s215_s2] ss:$0 sm:$0xff] }
   0x5   :  { %148 = vmatpush3.msra.mxu0 %v27_v1 }
   0x6   :  { %149 = vmatprep.subr.mxu0 %v26_v4 }
   0x7   :  { %150 = vmatpush3.msra.mxu0 %v26_v4 }
   0x8   :  { %151 = vmatprep.subr.mxu0 %v25_v5  ;;  %v22_v7 = vld [vmem:[#allocation2 + $0x8] sm:$0xff]  ;;  %v21_v9 = vld [vmem:[#allocation2] sm:$0xff] }
   0x9   :  { %152 = vmatpush3.msra.mxu0 %v25_v5 }
   0xa   :  { %154 = vmatmul.mubr.msk.f32.vlgmr.msra.gmra.mxu0 %vm29_vm0, %v24_v6 }
  0xca   :  { %v155_v8 = vpop.f32.mrf.mxu0 }
  0xcb   :  { %v112_v10 = vadd.f32 %v155_v8, %v22_v7 }
  0xcc   :  { %v102_v11 = vpop.f32.mrf.mxu0 }
  0xcd   :  { %115 = vst.msk [vmem:[#allocation2 + $0x8] sm:$0xff] %vm18_vm1, %v112_v10  ;;  %v111_v12 = vadd.f32 %v102_v11, %v21_v9 }
  0xcf   :  { %114 = vst.msk [vmem:[#allocation2] sm:$0xff] %vm18_vm1, %v111_v12 }
  0xd4   :  { %v120_v14 = vld [vmem:[#allocation2 + $0x8] sm:$0xff] }
  0xd5   :  { %v129_v15 = vadd.f32 %v138_v13, %v120_v14 }
  0xd6   :  { %v119_v16 = vld [vmem:[#allocation2] sm:$0xff] }
  0xd7   :  { %131 = vst.msk [vmem:[%s216_s3 + $0x8] sm:$0xff] %vm18_vm1, %v129_v15  ;;  %v128_v17 = vadd.f32 %v138_v13, %v119_v16 }
  0xd9   :  { %130 = vst.msk [vmem:[%s216_s3] sm:$0xff] %vm18_vm1, %v128_v17 }

// kernel: encoder_forward.17
= control target key start
LH: loop header
LB: loop body
LE: loop exit
PB: predicated region body
PF: predicated region fallthrough
CT: control target
= control target key end

     0   :  { %vm21_vm0 = vcmask 261120   ;;  %v163_v2 = vmov 0.0   ;;  %s230_s1 = inlined_call_operand.vmem [shape: f32[32,32], index: 1, kind: input, shape index: {}]   ;;  %s231_s0 = inlined_call_operand.vmem [shape: f32[16,32], index: 0, kind: input, shape index: {}]   ;;  %s232_s2 = inlined_call_operand.vmem [shape: f32[1,32], index: 2, kind: input, shape index: {}]   ;;  %s233_s3 = inlined_call_operand.vmem [shape: f32[16,32], index: 3, kind: input, shape index: {}]   ;;  %s234_s4 = inlined_call_operand.vmem [shape: f32[16,32], index: 4, kind: output, shape index: {}]  }
   0x1   :  { %v31_v0 = vld [vmem:[%s230_s1 + $0x18] sm:$0xff]  ;;  %v30_v1 = vld [vmem:[%s230_s1 + $0x10] sm:$0xff]  ;;  %23 = vst.msk [vmem:[#allocation2 + $0x8] sm:$0xff] %vm21_vm0, %v163_v2  ;;  %22 = vst.msk [vmem:[#allocation2] sm:$0xff] %vm21_vm0, %v163_v2 }
   0x2   :  { %151 = vmatprep.subr.mxu0 %v31_v0  ;;  %v26_v3 = vld [vmem:[%s231_s0] sm:$0xff]  ;;  %v29_v4 = vld [vmem:[%s230_s1 + $0x8] sm:$0xff] }
   0x3   :  { %152 = vmatpush3.msra.mxu0 %v31_v0  ;;  %159 = vmatprep.mubr.msk.f32.mxu0 %vm21_vm0, %v26_v3  ;;  %v28_v5 = vld [vmem:[%s230_s1] sm:$0xff]  ;;  %v27_v6 = vld [vmem:[%s231_s0 + $0x8] sm:$0xff] }
   0x4   :  { %153 = vmatprep.subr.mxu0 %v30_v1  ;;  %v144_v13 = vld [vmem:[%s232_s2] ss:$0 sm:$0xff]  ;;  %v133_v15 = vld [vmem:[%s233_s3 + $0x8] sm:$0xff] }
   0x5   :  { %154 = vmatpush3.msra.mxu0 %v30_v1  ;;  %v132_v18 = vld [vmem:[%s233_s3] sm:$0xff] }
   0x6   :  { %155 = vmatprep.subr.mxu0 %v29_v4 }
   0x7   :  { %156 = vmatpush3.msra.mxu0 %v29_v4 }
   0x8   :  { %157 = vmatprep.subr.mxu0 %v28_v5  ;;  %v25_v7 = vld [vmem:[#allocation2 + $0x8] sm:$0xff]  ;;  %v24_v9 = vld [vmem:[#allocation2] sm:$0xff] }
   0x9   :  { %158 = vmatpush3.msra.mxu0 %v28_v5 }
   0xa   :  { %160 = vmatmul.mubr.msk.f32.vlgmr.msra.gmra.mxu0 %vm21_vm0, %v27_v6 }
  0xca   :  { %v161_v8 = vpop.f32.mrf.mxu0 }
  0xcb   :  { %v115_v10 = vadd.f32 %v161_v8, %v25_v7 }
  0xcc   :  { %v105_v11 = vpop.f32.mrf.mxu0 }
  0xcd   :  { %117 = vst.msk [vmem:[#allocation2 + $0x8] sm:$0xff] %vm21_vm0, %v115_v10  ;;  %v114_v12 = vadd.f32 %v105_v11, %v24_v9 }
  0xcf   :  { %116 = vst.msk [vmem:[#allocation2] sm:$0xff] %vm21_vm0, %v114_v12 }
  0xd4   :  { %v122_v14 = vld [vmem:[#allocation2 + $0x8] sm:$0xff] }
  0xd5   :  { %v131_v16 = vadd.f32 %v144_v13, %v122_v14 }
  0xd6   :  { %v121_v17 = vld [vmem:[#allocation2] sm:$0xff] }
  0xd7   :  { %v135_v19 = vadd.f32 %v133_v15, %v131_v16  ;;  %v130_v20 = vadd.f32 %v144_v13, %v121_v17 }
  0xd9   :  { %137 = vst.msk [vmem:[%s234_s4 + $0x8] sm:$0xff] %vm21_vm0, %v135_v19  ;;  %v134_v21 = vadd.f32 %v132_v18, %v130_v20 }
  0xdb   :  { %136 = vst.msk [vmem:[%s234_s4] sm:$0xff] %vm21_vm0, %v134_v21 }

// kernel: encoder_forward.16
= control target key start
LH: loop header
LB: loop body
LE: loop exit
PB: predicated region body
PF: predicated region fallthrough
CT: control target
= control target key end

     0   :  { %s1061_s9 = smov 0   ;;  %s1148_s0 = inlined_call_operand.vmem [shape: f32[2,8,96], index: 0, kind: input, shape index: {}]   ;;  %s1149_s1 = inlined_call_operand.vmem [shape: f32[2,1,8], index: 1, kind: input, shape index: {}]   ;;  %s1150_s2 = inlined_call_operand.vmem [shape: f32[2,8,32], index: 2, kind: output, shape index: {}]  }
   0x1 LB: > { %s904_s10 = sadd.s32 4294967295, %s1028_s9   ;;  %p908_p0 = scmp.ge.s32.totalorder %s1028_s9, 1  ;;  %s1028_s9 = sphi %s1061_s9, %s12_s9  }
   0x2   : > { %p119_p1 = scmp.lt.s32.totalorder %s1028_s9, 3 }
   0x4   : > { %p120_p2 = pnand %p908_p0, %p119_p1 }
   0x5   : > { %p142_p3 = scmp.lt.s32.totalorder (!%p120_p2), %s904_s10, 1  ;;  %s1032_s15 = smov (!%p120_p2), 96  }
   0x6   : > { %123 = sbr.rel (%p120_p2) target bundleno = 1469 (0x5bd), region = 28  ;;  %s1033_s16 = smov (!%p120_p2), 64  }
   0x7   : > { %s1034_s17 = smov (!%p120_p2), 88   ;;  %s1035_s18 = smov (!%p120_p2), 120  }
   0x8   : > { %s1036_s19 = smov (!%p120_p2), 80   ;;  %s1037_s23 = smov (!%p120_p2), 72  }
   0x9   : > { %s1038_s24 = smov (!%p120_p2), 112   ;;  %s1039_s25 = smov (!%p120_p2), 104  }
   0xa   : > { %s1040_s26 = smov (!%p120_p2), 56   ;;  %s1041_s27 = smov (!%p120_p2), 40  }
   0xb   : > { %v1030_v0 = vmov 0.0   ;;  %vm1031_vm0 = vmmov 0   ;;  %s1152_s10 = smov (!%p142_p3, %s904_s10), 1  ;;  %vm165_vm1 = vcmask 64512   ;;  %s1042_s28 = smov 48   ;;  %vm836_vm2 = vcmask 130048  }
   0xc   : > { %942 = vmatprep.subr.mxu0 %v1030_v0  ;;  %944 = vmatprep.mubr.msk.f32.mxu0 %vm1031_vm0, %v1030_v0  ;;  %s909_s11 = sshll.u32 %s1152_s10, 3  ;;  %s148_s22 = scalar_lea.vmem %s1149_s1, %s1152_s10  ;;  %vm838_vm3 = vcmask 195584   ;;  %vm840_vm4 = vcmask 261120  }
   0xd   : > { %947 = vmatprep.subr.mxu1 %v1030_v0  ;;  %949 = vmatprep.mubr.msk.f32.mxu1 %vm1031_vm0, %v1030_v0  ;;  %s145_s14 = scalar_lea.vmem %s1148_s0, %s909_s11  ;;  %v911_v4 = vld [vmem:[%s148_s22] ss:$0 sm:$0xff]  ;;  %s1043_s29 = smov 8  }
   0xe   : > { %v1083_v1 = vld [vmem:[%s145_s14] sm:$0xff]  ;;  %s1044_s30 = smov 16   ;;  %s1045_s3 = smov 24  }
   0xf   : > { %163 = vrot.lane.b32.xlu0 %v1083_v1, %s1032_s15  ;;  %v155_v3 = vmul.f32 0.35355338, %v1083_v1  ;;  %252 = vrot.lane.b32.xlu1 %v1083_v1, %s1033_s16  ;;  %s152_s6 = scalar_lea.vmem %s1150_s2, %s909_s11 }
  0x13   : > { %330 = vrot.lane.b32.xlu1 %v1083_v1, %s1034_s17 }
  0x17   : > { %328 = vrot.lane.b32.xlu1 %v155_v3, %s1035_s18 }
  0x1b   : > { %495 = vrot.lane.b32.xlu1 %v1083_v1, %s1036_s19 }
  0x81   : > { %v164_v2 = vpop.permute.xlu0 %163  ;;  %v253_v9 = vpop.permute.xlu1 %252 }
  0x82   : > { %943 = vmatpush3.xpose.msk.msra.mxu0 %vm165_vm1, %v164_v2  ;;  %948 = vmatpush3.msra.mxu1 %v253_v9 }
  0x83   : > { %957 = vmatprep.subr.mxu0 %v1030_v0  ;;  %952 = vmatprep.subr.mxu1 %v1030_v0 }
  0x85   : > { %945 = vmatmul.mubr.msk.f32.vlgmr.msra.gmra.mxu0 %vm165_vm1, %v155_v3  ;;  %v331_v15 = vpop.permute.xlu1 %330 }
  0x86   : > { %959 = vmatprep.mubr.msk.f32.mxu0 %vm1031_vm0, %v1030_v0 }
  0x89   : > { %v329_v16 = vpop.permute.xlu1 %328 }
  0x8d   : > { %v496_v17 = vpop.permute.xlu1 %495 }
 0x145   : > { %v237_v5 = vpop.f32.mrf.mxu0 }
 0x146   : > { %v238_v6 = vadd.f32 %v911_v4, %v237_v5 }
 0x147   : > { %v946_v7 = vpop.f32.mrf.mxu0 }
 0x148   : > { %v241_v8 = vsel %vm165_vm1, %v238_v6, -inf }
 0x149   : > { %242 = vmax.xlane.f32.xlu0 %v241_v8 }
 0x15f   : > { %660 = vrot.lane.b32.xlu0 %v1083_v1, %s1037_s23 }
 0x1d2   : > { %v243_v10 = vpop.xlane.xlu0 %242 }
 0x1d3   : > { %v244_v11 = vsub.f32 %v238_v6, %v243_v10 }
 0x1d5   : > { %v245_v12 = vmul.f32 1.442695, %v244_v11 }
 0x1d6   : > { %v661_v22 = vpop.permute.xlu0 %660 }
 0x1d7   : > { %1006 = vpow2.f32 %v245_v12 }
 0x1e4   : > { %v1007_v13 = vpop.eup %1006 }
 0x1e5   : > { %v247_v14 = vsel %vm165_vm1, %v1007_v13, 0.0 }
 0x1e6   : > { %248 = vadd.xlane.f32.xlu1 %v247_v14 }
 0x1f7   : > { %493 = vrot.lane.b32.xlu1 %v155_v3, %s1038_s24 }
 0x1fb   : > { %658 = vrot.lane.b32.xlu1 %v155_v3, %s1039_s25 }
 0x26f   : > { %v249_v18 = vpop.xlane.xlu1 %248 }
 0x270   : > { %1008 = vrcp.f32 %v249_v18 }
 0x273   : > { %v494_v21 = vpop.permute.xlu1 %493 }
 0x277   : > { %v659_v23 = vpop.permute.xlu1 %658 }
 0x27d   : > { %v1009_v19 = vpop.eup %1008 }
 0x27e   : > { %v251_v20 = vmul.f32 %v1009_v19, %v1007_v13 }
 0x280   : > { %950 = vmatmul.mubr.msk.f32.vlgmr.msra.gmra.mxu1 %vm165_vm1, %v251_v20 }
 0x281   : > { %953 = vmatpush3.xpose.msk.msra.mxu1 %vm165_vm1, %v331_v15  ;;  %954 = vmatprep.mubr.msk.f32.mxu1 %vm1031_vm0, %v1030_v0 }
 0x282   : > { %962 = vmatprep.subr.mxu1 %v1030_v0 }
 0x284   : > { %955 = vmatmul.mubr.msk.f32.vlgmr.msra.gmra.mxu1 %vm165_vm1, %v329_v16 }
 0x285   : > { %963 = vmatpush3.xpose.msk.msra.mxu1 %vm165_vm1, %v496_v17  ;;  %964 = vmatprep.mubr.msk.f32.mxu1 %vm1031_vm0, %v1030_v0 }
 0x286   : > { %972 = vmatprep.subr.mxu1 %v1030_v0 }
 0x288   : > { %965 = vmatmul.mubr.msk.f32.vlgmr.msra.gmra.mxu1 %vm165_vm1, %v494_v21 }
 0x289   : > { %973 = vmatpush3.xpose.msk.msra.mxu1 %vm165_vm1, %v661_v22  ;;  %974 = vmatprep.mubr.msk.f32.mxu1 %vm1031_vm0, %v1030_v0 }
 0x28c   : > { %975 = vmatmul.mubr.msk.f32.vlgmr.msra.gmra.mxu1 %vm165_vm1, %v659_v23 }
 0x340   : > { %v1118_v24 = vpop.f32.mrf.mxu1 }
 0x342   : > { %v951_v25 = vpop.f32.mrf.mxu1 }
 0x344   : > { %v402_v26 = vpop.f32.mrf.mxu1 }
 0x345   : > { %v403_v27 = vadd.f32 %v911_v4, %v402_v26 }
 0x346   : > { %v956_v28 = vpop.f32.mrf.mxu1 }
 0x347   : > { %v406_v29 = vsel %vm165_vm1, %v403_v27, -inf }
 0x348   : > { %407 = vmax.xlane.f32.xlu1 %v406_v29  ;;  %v567_v30 = vpop.f32.mrf.mxu1 }
 0x349   : > { %v568_v31 = vadd.f32 %v911_v4, %v567_v30 }
 0x34a   : > { %v966_v32 = vpop.f32.mrf.mxu1 }
 0x34b   : > { %v571_v33 = vsel %vm165_vm1, %v568_v31, -inf }
 0x34c   : > { %572 = vmax.xlane.f32.xlu0 %v571_v33  ;;  %v732_v34 = vpop.f32.mrf.mxu1 }
 0x34d   : > { %v733_v35 = vadd.f32 %v911_v4, %v732_v34 }
 0x34e   : > { %v976_v36 = vpop.f32.mrf.mxu1 }
 0x34f   : > { %v736_v37 = vsel %vm165_vm1, %v733_v35, -inf }
 0x350   : > { %737 = vmax.xlane.f32.xlu1 %v736_v37 }
 0x361   : > { %417 = vrot.lane.b32.xlu1 %v1083_v1, %s1040_s26 }
 0x3d1   : > { %v408_v38 = vpop.xlane.xlu1 %407 }
 0x3d2   : > { %v409_v39 = vsub.f32 %v403_v27, %v408_v38 }
 0x3d4   : > { %v410_v40 = vmul.f32 1.442695, %v409_v39 }
 0x3d5   : > { %v573_v41 = vpop.xlane.xlu0 %572 }
 0x3d6   : > { %1010 = vpow2.f32 %v410_v40  ;;  %v574_v42 = vsub.f32 %v568_v31, %v573_v41 }
 0x3d8   : > { %v575_v43 = vmul.f32 1.442695, %v574_v42 }
 0x3d9   : > { %v738_v44 = vpop.xlane.xlu1 %737 }
 0x3da   : > { %1012 = vpow2.f32 %v575_v43  ;;  %v739_v45 = vsub.f32 %v733_v35, %v738_v44 }
 0x3dc   : > { %v740_v46 = vmul.f32 1.442695, %v739_v45 }
 0x3dd   : > { %v418_v47 = vpop.permute.xlu1 %417 }
 0x3de   : > { %1014 = vpow2.f32 %v740_v46  ;;  %958 = vmatpush3.msra.mxu0 %v418_v47 }
 0x3df   : > { %967 = vmatprep.subr.mxu0 %v1030_v0 }
 0x3e3   : > { %v1011_v48 = vpop.eup %1010 }
 0x3e4   : > { %v412_v49 = vsel %vm165_vm1, %v1011_v48, 0.0 }
 0x3e5   : > { %413 = vadd.xlane.f32.xlu1 %v412_v49 }
 0x3e7   : > { %v1013_v50 = vpop.eup %1012 }
 0x3e8   : > { %v577_v51 = vsel %vm165_vm1, %v1013_v50, 0.0 }
 0x3e9   : > { %578 = vadd.xlane.f32.xlu1 %v577_v51 }
 0x3eb   : > { %v1015_v52 = vpop.eup %1014 }
 0x3ec   : > { %v742_v53 = vsel %vm165_vm1, %v1015_v52, 0.0 }
 0x3ed   : > { %743 = vadd.xlane.f32.xlu0 %v742_v53 }
 0x3fa   : > { %747 = vrot.lane.b32.xlu1 %v1083_v1, %s1041_s27 }
 0x403   : > { %582 = vrot.lane.b32.xlu0 %v1083_v1, %s1042_s28 }
 0x46e   : > { %v414_v54 = vpop.xlane.xlu1 %413 }
 0x46f   : > { %1016 = vrcp.f32 %v414_v54 }
 0x472   : > { %v579_v55 = vpop.xlane.xlu1 %578 }
 0x473   : > { %1018 = vrcp.f32 %v579_v55 }
 0x476   : > { %v744_v56 = vpop.xlane.xlu0 %743  ;;  %v748_v61 = vpop.permute.xlu1 %747 }
 0x477   : > { %1020 = vrcp.f32 %v744_v56 }
 0x47a   : > { %v583_v58 = vpop.permute.xlu0 %582 }
 0x47c   : > { %v1017_v57 = vpop.eup %1016 }
 0x47d   : > { %v416_v59 = vmul.f32 %v1017_v57, %v1011_v48 }
 0x47f   : > { %960 = vmatmul.mubr.msk.f32.vlgmr.msra.gmra.mxu0 %vm165_vm1, %v416_v59 }
 0x480   : > { %v1019_v60 = vpop.eup %1018  ;;  %968 = vmatpush3.msra.mxu0 %v583_v58  ;;  %969 = vmatprep.mubr.msk.f32.mxu0 %vm1031_vm0, %v1030_v0 }
 0x481   : > { %977 = vmatprep.subr.mxu0 %v1030_v0  ;;  %v581_v62 = vmul.f32 %v1019_v60, %v1013_v50 }
 0x483   : > { %970 = vmatmul.mubr.msk.f32.vlgmr.msra.gmra.mxu0 %vm165_vm1, %v581_v62 }
 0x484   : > { %v1021_v63 = vpop.eup %1020  ;;  %978 = vmatpush3.msra.mxu0 %v748_v61  ;;  %979 = vmatprep.mubr.msk.f32.mxu0 %vm1031_vm0, %v1030_v0 }
 0x485   : > { %v746_v1 = vmul.f32 %v1021_v63, %v1015_v52 }
 0x487   : > { %980 = vmatmul.mubr.msk.f32.vlgmr.msra.gmra.mxu0 %vm165_vm1, %v746_v1 }
 0x53f   : > { %v489_v2 = vpop.f32.mrf.mxu0 }
 0x540   : > { %824 = vrot.lane.b32.xlu1 %v489_v2, %s1043_s29 }
 0x541   : > { %v961_v3 = vpop.f32.mrf.mxu0 }
 0x543   : > { %v654_v4 = vpop.f32.mrf.mxu0 }
 0x544   : > { %828 = vrot.lane.b32.xlu0 %v654_v4, %s1044_s30 }
 0x545   : > { %v971_v5 = vpop.f32.mrf.mxu0 }
 0x547   : > { %v819_v6 = vpop.f32.mrf.mxu0 }
 0x548   : > { %832 = vrot.lane.b32.xlu1 %v819_v6, %s1045_s3 }
 0x549   : > { %v981_v7 = vpop.f32.mrf.mxu0 }
 0x5b2   : > { %v825_v8 = vpop.permute.xlu1 %824 }
 0x5b3   : > { %v835_v0 = vsel %vm165_vm1, %v1118_v24, %v825_v8 }
 0x5b6   : > { %v829_v9 = vpop.permute.xlu0 %828 }
 0x5b7   : > { %v837_v10 = vsel %vm836_vm2, %v835_v0, %v829_v9 }
 0x5ba   : > { %v833_v11 = vpop.permute.xlu1 %832 }
 0x5bb   : > { %v839_v12 = vsel %vm838_vm3, %v837_v10, %v833_v11 }
 0x5bc   : > { %841 = vst.msk [vmem:[%s152_s6] sm:$0xff] %vm840_vm4, %v839_v12 }
 0x5bd PF: > { %s12_s9 = sadd.s32 1, %s1028_s9  }
 0x5be   : > { %p9_p4 = scmp.ge.s32.totalorder %s12_s9, 4  }
 0x5c0   :  { %11 = sbr.rel (!%p9_p4) target bundleno = 1 (0x1), region = 61 }

// kernel: encoder_forward.19
= control target key start
LH: loop header
LB: loop body
LE: loop exit
PB: predicated region body
PF: predicated region fallthrough
CT: control target
= control target key end

     0   :  { %vm28_vm0 = vcmask 261120   ;;  %s205_s1 = inlined_call_operand.vmem [shape: f32[32,128], index: 1, kind: input, shape index: {}]   ;;  %s206_s0 = inlined_call_operand.vmem [shape: f32[16,32], index: 0, kind: input, shape index: {}]   ;;  %s207_s2 = inlined_call_operand.vmem [shape: f32[1,128], index: 2, kind: input, shape index: {}]   ;;  %s208_s3 = inlined_call_operand.vmem [shape: f32[16,128], index: 3, kind: output, shape index: {}]  }
   0x1   :  { %v27_v0 = vld [vmem:[%s205_s1 + $0x18] sm:$0xff]  ;;  %v26_v1 = vld [vmem:[%s205_s1 + $0x10] sm:$0xff]  ;;  %v22_v2 = vld [vmem:[%s206_s0] sm:$0xff] }
   0x2   :  { %145 = vmatprep.subr.mxu0 %v27_v0  ;;  %v25_v3 = vld [vmem:[%s205_s1 + $0x8] sm:$0xff]  ;;  %153 = vmatprep.mubr.msk.f32.mxu0 %vm28_vm0, %v22_v2  ;;  %v24_v4 = vld [vmem:[%s205_s1] sm:$0xff] }
   0x3   :  { %146 = vmatpush3.msra.mxu0 %v27_v0  ;;  %v23_v5 = vld [vmem:[%s206_s0 + $0x8] sm:$0xff]  ;;  %v138_v6 = vld [vmem:[%s207_s2] ss:$0 sm:$0xff] }
   0x4   :  { %147 = vmatprep.subr.mxu0 %v26_v1 }
   0x5   :  { %148 = vmatpush3.msra.mxu0 %v26_v1 }
   0x6   :  { %149 = vmatprep.subr.mxu0 %v25_v3 }
   0x7   :  { %150 = vmatpush3.msra.mxu0 %v25_v3 }
   0x8   :  { %151 = vmatprep.subr.mxu0 %v24_v4 }
   0x9   :  { %152 = vmatpush3.msra.mxu0 %v24_v4 }
   0xa   :  { %154 = vmatmul.mubr.msk.f32.vlgmr.msra.gmra.mxu0 %vm28_vm0, %v23_v5 }
  0xca   :  { %v155_v7 = vpop.f32.mrf.mxu0 }
  0xcb   :  { %v127_v8 = vadd.f32 %v155_v7, %v138_v6 }
  0xcc   :  { %v101_v9 = vpop.f32.mrf.mxu0 }
  0xcd   :  { %v129_v10 = vmax.f32 %v127_v8, 0.0  ;;  %v126_v11 = vadd.f32 %v138_v6, %v101_v9 }
  0xcf   :  { %131 = vst [vmem:[%s208_s3 + $0x8] sm:$0xff] %v129_v10  ;;  %v128_v12 = vmax.f32 %v126_v11, 0.0 }
  0xd1   :  { %130 = vst [vmem:[%s208_s3] sm:$0xff] %v128_v12 }

// kernel: encoder_forward.20
= control target key start
LH: loop header
LB: loop body
LE: loop exit
PB: predicated region body
PF: predicated region fallthrough
CT: control target
= control target key end

     0   :  { %vm21_vm0 = vcmask 261120   ;;  %v203_v2 = vmov 0.0   ;;  %s304_s1 = inlined_call_operand.vmem [shape: f32[128,32], index: 1, kind: input, shape index: {}]   ;;  %s305_s0 = inlined_call_operand.vmem [shape: f32[16,128], index: 0, kind: input, shape index: {}]   ;;  %s306_s2 = inlined_call_operand.vmem [shape: f32[1,32], index: 2, kind: input, shape index: {}]   ;;  %s307_s3 = inlined_call_operand.vmem [shape: f32[16,32], index: 3, kind: input, shape index: {}]   ;;  %s308_s4 = inlined_call_operand.vmem [shape: f32[16,32], index: 4, kind: output, shape index: {}]  }
   0x1   :  { %v43_v0 = vld [vmem:[%s304_s1 + $0x78] sm:$0xff]  ;;  %v42_v1 = vld [vmem:[%s304_s1 + $0x70] sm:$0xff]  ;;  %23 = vst.msk [vmem:[#allocation2 + $0x8] sm:$0xff] %vm21_vm0, %v203_v2  ;;  %22 = vst.msk [vmem:[#allocation2] sm:$0xff] %vm21_vm0, %v203_v2 }
   0x2   :  { %167 = vmatprep.subr.mxu0 %v43_v0  ;;  %v41_v3 = vld [vmem:[%s304_s1 + $0x68] sm:$0xff]  ;;  %v40_v4 = vld [vmem:[%s304_s1 + $0x60] sm:$0xff]  ;;  %v39_v6 = vld [vmem:[%s304_s1 + $0x58] sm:$0xff] }
   0x3   :  { %168 = vmatpush3.msra.mxu0 %v43_v0  ;;  %v26_v5 = vld [vmem:[%s305_s0] sm:$0xff]  ;;  %v38_v7 = vld [vmem:[%s304_s1 + $0x50] sm:$0xff]  ;;  %v37_v8 = vld [vmem:[%s304_s1 + $0x48] sm:$0xff] }
   0x4   :  { %169 = vmatprep.subr.mxu0 %v42_v1  ;;  %199 = vmatprep.mubr.f32.mxu0 %v26_v5  ;;  %v36_v9 = vld [vmem:[%s304_s1 + $0x40] sm:$0xff]  ;;  %v35_v10 = vld [vmem:[%s304_s1 + $0x38] sm:$0xff]  ;;  %v34_v11 = vld [vmem:[%s304_s1 + $0x30] sm:$0xff] }
   0x5   :  { %170 = vmatpush3.msra.mxu0 %v42_v1  ;;  %v33_v12 = vld [vmem:[%s304_s1 + $0x28] sm:$0xff]  ;;  %v32_v13 = vld [vmem:[%s304_s1 + $0x20] sm:$0xff]  ;;  %v31_v14 = vld [vmem:[%s304_s1 + $0x18] sm:$0xff] }
   0x6   :  { %171 = vmatprep.subr.mxu0 %v41_v3  ;;  %v30_v15 = vld [vmem:[%s304_s1 + $0x10] sm:$0xff]  ;;  %v29_v16 = vld [vmem:[%s304_s1 + $0x8] sm:$0xff]  ;;  %v28_v17 = vld [vmem:[%s304_s1] sm:$0xff] }
   0x7   :  { %172 = vmatpush3.msra.mxu0 %v41_v3  ;;  %v27_v18 = vld [vmem:[%s305_s0 + $0x8] sm:$0xff]  ;;  %v148_v25 = vld [vmem:[%s306_s2] ss:$0 sm:$0xff] }
   0x8   :  { %173 = vmatprep.subr.mxu0 %v40_v4  ;;  %v25_v19 = vld [vmem:[#allocation2 + $0x8] sm:$0xff]  ;;  %v24_v21 = vld [vmem:[#allocation2] sm:$0xff] }
   0x9   :  { %174 = vmatpush3.msra.mxu0 %v40_v4  ;;  %v139_v27 = vld [vmem:[%s307_s3 + $0x8] sm:$0xff]  ;;  %v138_v29 = vld [vmem:[%s307_s3] sm:$0xff] }
   0xa   :  { %175 = vmatprep.subr.mxu0 %v39_v6 }
   0xb   :  { %176 = vmatpush3.msra.mxu0 %v39_v6 }
   0xc   :  { %177 = vmatprep.subr.mxu0 %v38_v7 }
   0xd   :  { %178 = vmatpush3.msra.mxu0 %v38_v7 }
   0xe   :  { %179 = vmatprep.subr.mxu0 %v37_v8 }
   0xf   :  { %180 = vmatpush3.msra.mxu0 %v37_v8 }
  0x10   :  { %181 = vmatprep.subr.mxu0 %v36_v9 }
  0x11   :  { %182 = vmatpush3.msra.mxu0 %v36_v9 }
  0x12   :  { %183 = vmatprep.subr.mxu0 %v35_v10 }
  0x13   :  { %184 = vmatpush3.msra.mxu0 %v35_v10 }
  0x14   :  { %185 = vmatprep.subr.mxu0 %v34_v11 }
  0x15   :  { %186 = vmatpush3.msra.mxu0 %v34_v11 }
  0x16   :  { %187 = vmatprep.subr.mxu0 %v33_v12 }
  0x17   :  { %188 = vmatpush3.msra.mxu0 %v33_v12 }
  0x18   :  { %189 = vmatprep.subr.mxu0 %v32_v13 }
  0x19   :  { %190 = vmatpush3.msra.mxu0 %v32_v13 }
  0x1a   :  { %191 = vmatprep.subr.mxu0 %v31_v14 }
  0x1b   :  { %192 = vmatpush3.msra.mxu0 %v31_v14 }
  0x1c   :  { %193 = vmatprep.subr.mxu0 %v30_v15 }
  0x1d   :  { %194 = vmatpush3.msra.mxu0 %v30_v15 }
  0x1e   :  { %195 = vmatprep.subr.mxu0 %v29_v16 }
  0x1f   :  { %196 = vmatpush3.msra.mxu0 %v29_v16 }
  0x20   :  { %197 = vmatprep.subr.mxu0 %v28_v17 }
  0x21   :  { %198 = vmatpush3.msra.mxu0 %v28_v17 }
  0x22   :  { %200 = vmatmul.mubr.f32.vlgmr.msra.gmra.mxu0 %v27_v18 }
  0xe2   :  { %v201_v20 = vpop.f32.mrf.mxu0 }
  0xe3   :  { %v120_v22 = vadd.f32 %v201_v20, %v25_v19 }
  0xe4   :  { %v110_v23 = vpop.f32.mrf.mxu0 }
  0xe5   :  { %123 = vst.msk [vmem:[#allocation2 + $0x8] sm:$0xff] %vm21_vm0, %v120_v22  ;;  %v119_v24 = vadd.f32 %v110_v23, %v24_v21 }
  0xe7   :  { %122 = vst.msk [vmem:[#allocation2] sm:$0xff] %vm21_vm0, %v119_v24 }
  0xec   :  { %v128_v26 = vld [vmem:[#allocation2 + $0x8] sm:$0xff] }
  0xed   :  { %v137_v28 = vadd.f32 %v148_v25, %v128_v26 }
  0xee   :  { %v127_v30 = vld [vmem:[#allocation2] sm:$0xff] }
  0xef   :  { %v141_v31 = vadd.f32 %v139_v27, %v137_v28  ;;  %v136_v32 = vadd.f32 %v148_v25, %v127_v30 }
  0xf1   :  { %143 = vst.msk [vmem:[%s308_s4 + $0x8] sm:$0xff] %vm21_vm0, %v141_v31  ;;  %v140_v33 = vadd.f32 %v138_v29, %v136_v32 }
  0xf3   :  { %142 = vst.msk [vmem:[%s308_s4] sm:$0xff] %vm21_vm0, %v140_v33 }

// kernel: encoder_forward.27
= control target key start
LH: loop header
LB: loop body
LE: loop exit
PB: predicated region body
PF: predicated region fallthrough
CT: control target
= control target key end

     0   :  { %vm22_vm0 = vcmask 261120   ;;  %v241_v2 = vmov 0.0   ;;  %s342_s0 = inlined_call_operand.vmem [shape: f32[16,128], index: 0, kind: input, shape index: {}]   ;;  %s343_s1 = inlined_call_operand.vmem [shape: f32[128,32], index: 1, kind: input, shape index: {}]   ;;  %s344_s2 = inlined_call_operand.vmem [shape: f32[1,32], index: 2, kind: input, shape index: {}]   ;;  %s345_s3 = inlined_call_operand.vmem [shape: f32[16,32], index: 3, kind: input, shape index: {}]   ;;  %s346_s4 = inlined_call_operand.hbm [shape: f32[16,32], index: 4, kind: output, shape index: {}]  }
   0x1   :  { %v44_v0 = vld [vmem:[%s343_s1 + $0x78] sm:$0xff]  ;;  %v43_v1 = vld [vmem:[%s343_s1 + $0x70] sm:$0xff]  ;;  %24 = vst.msk [vmem:[#allocation2 + $0x8] sm:$0xff] %vm22_vm0, %v241_v2  ;;  %23 = vst.msk [vmem:[#allocation2] sm:$0xff] %vm22_vm0, %v241_v2 }
   0x2   :  { %180 = vmatprep.subr.mxu0 %v44_v0  ;;  %v42_v3 = vld [vmem:[%s343_s1 + $0x68] sm:$0xff]  ;;  %v41_v4 = vld [vmem:[%s343_s1 + $0x60] sm:$0xff]  ;;  %v40_v6 = vld [vmem:[%s343_s1 + $0x58] sm:$0xff] }
   0x3   :  { %181 = vmatpush3.msra.mxu0 %v44_v0  ;;  %v27_v5 = vld [vmem:[%s342_s0] sm:$0xff] }
   0x4   :  { %182 = vmatprep.subr.mxu0 %v43_v1  ;;  %212 = vmatprep.mubr.f32.mxu0 %v27_v5 }
   0x5   :  { %183 = vmatpush3.msra.mxu0 %v43_v1 }
   0x6   :  { %184 = vmatprep.subr.mxu0 %v42_v3 }
   0x7   :  { %185 = vmatpush3.msra.mxu0 %v42_v3 }
   0x8   :  { %9 = vsyncpa [#allocation4], 0  ;;  %186 = vmatprep.subr.mxu0 %v41_v4  ;;  %v39_v7 = vld [vmem:[%s343_s1 + $0x50] sm:$0xff]  ;;  %v38_v8 = vld [vmem:[%s343_s1 + $0x48] sm:$0xff]  ;;  %s242_s27 = smov [#allocation3]  }
   0x9   :  { %187 = vmatpush3.msra.mxu0 %v41_v4  ;;  %v37_v9 = vld [vmem:[%s343_s1 + $0x40] sm:$0xff]  ;;  %v36_v10 = vld [vmem:[%s343_s1 + $0x38] sm:$0xff]  ;;  %v35_v11 = vld [vmem:[%s343_s1 + $0x30] sm:$0xff]  ;;  %s150_s28 = sshll.u32 %s242_s27, 4  ;;  %s151_s28 = int_to_ptr.vmem [resolvable:$true] %s150_s28 }
   0xa   :  { %188 = vmatprep.subr.mxu0 %v40_v6  ;;  %v34_v12 = vld [vmem:[%s343_s1 + $0x28] sm:$0xff]  ;;  %v33_v13 = vld [vmem:[%s343_s1 + $0x20] sm:$0xff]  ;;  %v32_v14 = vld [vmem:[%s343_s1 + $0x18] sm:$0xff]  ;;  %p224_p1 = scmp.lt.s32.totalorder %s151_s28, %s151_s28 }
   0xb   :  { %189 = vmatpush3.msra.mxu0 %v40_v6  ;;  %v31_v15 = vld [vmem:[%s343_s1 + $0x10] sm:$0xff]  ;;  %v30_v16 = vld [vmem:[%s343_s1 + $0x8] sm:$0xff]  ;;  %v29_v17 = vld [vmem:[%s343_s1] sm:$0xff] }
   0xc   :  { %190 = vmatprep.subr.mxu0 %v39_v7  ;;  %v28_v18 = vld [vmem:[%s342_s0 + $0x8] sm:$0xff]  ;;  %v25_v21 = vld [vmem:[#allocation2] sm:$0xff] }
   0xd   :  { %191 = vmatpush3.msra.mxu0 %v39_v7  ;;  %v26_v19 = vld [vmem:[#allocation2 + $0x8] sm:$0xff]  ;;  %v161_v25 = vld [vmem:[%s344_s2] ss:$0 sm:$0xff]  ;;  %s219_s2 = scalar_lea.vmem %s151_s28, 256 }
   0xe   :  { %192 = vmatprep.subr.mxu0 %v38_v8  ;;  %v140_v27 = vld [vmem:[%s345_s3 + $0x8] sm:$0xff]  ;;  %v139_v30 = vld [vmem:[%s345_s3] sm:$0xff]  ;;  %p220_p0 = scmp.ne.s32.totalorder %s151_s28, %s219_s2  ;;  %p225_p2 = scmp.lt.s32.totalorder %s219_s2, %s219_s2 }
   0xf   :  { %193 = vmatpush3.msra.mxu0 %v38_v8 }
  0x10   :  { %194 = vmatprep.subr.mxu0 %v37_v9  ;;  %p226_p3 = por %p225_p2, %p224_p1 }
  0x11   :  { %195 = vmatpush3.msra.mxu0 %v37_v9 }
  0x12   :  { %196 = vmatprep.subr.mxu0 %v36_v10  ;;  %p227_p4 = pnand %p226_p3, %p220_p0 }
  0x13   :  { %197 = vmatpush3.msra.mxu0 %v36_v10 }
  0x14   :  { %198 = vmatprep.subr.mxu0 %v35_v11 }
  0x15   :  { %199 = vmatpush3.msra.mxu0 %v35_v11 }
  0x16   :  { %200 = vmatprep.subr.mxu0 %v34_v12 }
  0x17   :  { %201 = vmatpush3.msra.mxu0 %v34_v12 }
  0x18   :  { %202 = vmatprep.subr.mxu0 %v33_v13 }
  0x19   :  { %203 = vmatpush3.msra.mxu0 %v33_v13 }
  0x1a   :  { %204 = vmatprep.subr.mxu0 %v32_v14 }
  0x1b   :  { %205 = vmatpush3.msra.mxu0 %v32_v14 }
  0x1c   :  { %206 = vmatprep.subr.mxu0 %v31_v15 }
  0x1d   :  { %207 = vmatpush3.msra.mxu0 %v31_v15 }
  0x1e   :  { %208 = vmatprep.subr.mxu0 %v30_v16 }
  0x1f   :  { %209 = vmatpush3.msra.mxu0 %v30_v16 }
  0x20   :  { %210 = vmatprep.subr.mxu0 %v29_v17 }
  0x21   :  { %211 = vmatpush3.msra.mxu0 %v29_v17 }
  0x22   :  { %213 = vmatmul.mubr.f32.vlgmr.msra.gmra.mxu0 %v28_v18 }
  0xe2   :  { %v214_v20 = vpop.f32.mrf.mxu0 }
  0xe3   :  { %v121_v22 = vadd.f32 %v214_v20, %v26_v19 }
  0xe4   :  { %v111_v23 = vpop.f32.mrf.mxu0 }
  0xe5   :  { %124 = vst.msk [vmem:[#allocation2 + $0x8] sm:$0xff] %vm22_vm0, %v121_v22  ;;  %v120_v24 = vadd.f32 %v111_v23, %v25_v21 }
  0xe7   :  { %123 = vst.msk [vmem:[#allocation2] sm:$0xff] %vm22_vm0, %v120_v24 }
  0xec   :  { %v129_v26 = vld [vmem:[#allocation2 + $0x8] sm:$0xff] }
  0xed   :  { %v138_v28 = vadd.f32 %v161_v25, %v129_v26 }
  0xee   :  { %v128_v29 = vld [vmem:[#allocation2] sm:$0xff] }
  0xef   :  { %v137_v31 = vadd.f32 %v161_v25, %v128_v29  ;;  %v142_v32 = vadd.f32 %v140_v27, %v138_v28 }
  0xf1   :  { %v141_v33 = vadd.f32 %v139_v30, %v137_v31  ;;  %144 = vst.msk [vmem:[#allocation3 + $0x8] sm:$0xff] %vm22_vm0, %v142_v32 }
  0xf3   :  { %143 = vst.msk [vmem:[#allocation3] sm:$0xff] %vm22_vm0, %v141_v33 }
  0xf4   :  { %230 = shalt.err (!%p227_p4)
}
  0xf5   :  { %s243_s5 = smov 128   ;;  %s244_s6 = smov 8  }
  0xf6   :  { %156 = dma.vmem_to_hbm [thread:$0]  %s151_s28, 256, %s346_s4, [#allocation4], %s243_s5, %s243_s5, %s244_s6  }
  0xf7   :  { %239 = dma.done.wait [#allocation4], 256  }
  0xf8   :  { %240 = vsyncadd [#allocation4], 4294967040 }
  0xf9   :  { %160 = vsyncpa [#allocation4], 1 }

</bundles_post_ra>
